<compile_context>
chip_gen: v6e
topology: v6e:2x2x1
jax: 0.10.0
libtpu: 0.0.40
codegen_flags: <defaults>
</compile_context>

<pallas_src>
import functools
import math

import jax
import jax.numpy as jnp
from jax import lax
from jax.experimental import pallas as pl
from jax.experimental.pallas import tpu as pltpu


def _round_up(n, m):
    return ((n + m - 1) // m) * m


def _decoder_kernel(p_dim, x_ref, w1_ref, b1_ref, w2_ref, b2_ref,
                    w3_ref, b3_ref, o_ref):
    # linear_1 (bf16 x bf16 -> f32 MXU accumulation) + leaky_relu(0.01)
    l1 = jnp.dot(x_ref[...], w1_ref[...],
                 preferred_element_type=jnp.float32) + b1_ref[...]
    l1 = jnp.maximum(l1, 0.01 * l1)          # == leaky_relu for slope < 1

    # linear_2 + leaky_relu(0.01)
    l2 = jnp.dot(l1.astype(w2_ref.dtype), w2_ref[...],
                 preferred_element_type=jnp.float32) + b2_ref[...]
    l2 = jnp.maximum(l2, 0.01 * l2)

    # linear_3
    l3 = jnp.dot(l2.astype(w3_ref.dtype), w3_ref[...],
                 preferred_element_type=jnp.float32) + b3_ref[...]

    # torch: .view(-1, 7, p_dim); cat([abs(first 3 channels), rest], 1)
    # == abs() on flat columns [0, 3*p_dim), identity elsewhere.
    split = 3 * p_dim
    if split % 128 == 0:
        # lane-aligned, unmasked stores (cast to output dtype at the store)
        o_ref[:, :split] = jnp.abs(l3[:, :split]).astype(o_ref.dtype)
        o_ref[:, split:] = l3[:, split:].astype(o_ref.dtype)
    else:
        col = lax.broadcasted_iota(jnp.int32, l3.shape, 1)
        o_ref[...] = jnp.where(col < split, jnp.abs(l3), l3).astype(o_ref.dtype)


def _choose_tiling(B, max_tile, multiple=16):
    """Pick (tile_b, padded_B, n_tiles) minimizing padded waste while keeping
    >=2 balanced tiles for larger batches (so v7x megacore can split them)."""
    Bm = _round_up(max(B, 1), multiple)
    if Bm <= max_tile:
        # Whole batch would fit one tile; still split in two for batches large
        # enough that the extra (<~16-row) padding is cheap relative to the
        # 2-TensorCore win on v7x.  No effect on v5e/v6e (1 TC).
        n = 2 if B >= 8 * multiple else 1
    else:
        n = pl.cdiv(Bm, max_tile)
    tile = _round_up(pl.cdiv(Bm, n), multiple)
    n = pl.cdiv(B, tile)
    return tile, n * tile, n


def decoder_forward(x, params, p_dim, tile_b=1024, out_dtype=jnp.bfloat16):
    w1, b1, w2, b2, w3, b3 = params
    B, d_in = x.shape
    d_h1 = w1.shape[1]
    d_h2 = w2.shape[1]
    d_out = w3.shape[1]
    assert d_out == 7 * p_dim

    # bf16 operands for the MXU; biases stay f32 (added post-accumulation).
    xb = x.astype(jnp.bfloat16)
    w1b = w1.astype(jnp.bfloat16)
    w2b = w2.astype(jnp.bfloat16)
    w3b = w3.astype(jnp.bfloat16)

    bf16_b, f32_b = 2, 4
    out_bytes = jnp.dtype(out_dtype).itemsize

    # Generation-aware VMEM ceiling: v7x has 64 MiB physical per TC,
    # v5e/v6e have 128 MiB.  Leave 25% headroom for compiler scratch.
    try:
        phys_vmem = getattr(pltpu.get_tpu_info(), "vmem_capacity_bytes", 64 << 20)
    except Exception:  # pragma: no cover - info query unavailable
        phys_vmem = 64 << 20
    vmem_cap = min(int(0.75 * phys_vmem), 96 << 20)

    weight_bytes = (d_in * d_h1 + d_h1 * d_h2 + d_h2 * d_out) * bf16_b
    bias_bytes = (d_h1 + d_h2 + d_out) * f32_b

    def vmem_est(tb):
        # Conservative: assume weights/biases are double-buffered even though
        # we request Buffered(1); account for l1/l2/l3 liveness; 1.5x slack.
        resident = 2 * (weight_bytes + bias_bytes)
        io = 2 * tb * (d_in * bf16_b + d_out * out_bytes)      # 2x-buffered tiles
        interm = tb * (d_h1 + d_h2 + 2 * d_out) * f32_b
        return int(1.5 * (resident + io + interm)) + (1 << 20)

    # Requested tile: multiple of 16 sublanes (bf16 packing), capped by the
    # (16-rounded) batch, shrunk until the VMEM estimate fits the chip.
    max_tile = max(16, _round_up(min(tile_b, _round_up(B, 16)), 16))
    while max_tile > 16 and vmem_est(max_tile) > vmem_cap:
        max_tile = max(16, _round_up(max_tile // 2, 16))

    tile_b, Bp, n_tiles = _choose_tiling(B, max_tile)
    if Bp != B:
        xb = jnp.pad(xb, ((0, Bp - B), (0, 0)))
    grid = (n_tiles,)

    vmem_limit = min(max(vmem_est(tile_b), 4 << 20), vmem_cap)

    flops = 2 * Bp * (d_in * d_h1 + d_h1 * d_h2 + d_h2 * d_out)
    bytes_accessed = (Bp * d_in * bf16_b + weight_bytes + bias_bytes
                      + Bp * d_out * out_bytes)
    cost = pl.CostEstimate(flops=flops, transcendentals=0,
                           bytes_accessed=bytes_accessed)

    def _resident_single(shape):
        # Constant index_map: the same tile is reused every grid step, so one
        # VMEM buffer suffices (halves resident weight VMEM for big ef_dim).
        return pl.BlockSpec(shape, lambda i: (0, 0),
                            pipeline_mode=pl.Buffered(1))

    def _resident_default(shape):
        return pl.BlockSpec(shape, lambda i: (0, 0))

    def build(resident_spec):
        return pl.pallas_call(
            functools.partial(_decoder_kernel, p_dim),
            out_shape=jax.ShapeDtypeStruct((Bp, d_out), out_dtype),
            grid_spec=pltpu.PrefetchScalarGridSpec(
                num_scalar_prefetch=0,
                grid=grid,
                in_specs=[
                    pl.BlockSpec((tile_b, d_in), lambda i: (i, 0)),  # x tile
                    resident_spec((d_in, d_h1)),                     # w1
                    resident_spec((1, d_h1)),                        # b1
                    resident_spec((d_h1, d_h2)),                     # w2
                    resident_spec((1, d_h2)),                        # b2
                    resident_spec((d_h2, d_out)),                    # w3
                    resident_spec((1, d_out)),                       # b3
                ],
                out_specs=pl.BlockSpec((tile_b, d_out), lambda i: (i, 0)),
            ),
            compiler_params=pltpu.CompilerParams(
                dimension_semantics=("parallel",),
                vmem_limit_bytes=vmem_limit,
            ),
            cost_estimate=cost,
        )

    args = (xb, w1b, b1, w2b, b2, w3b, b3)
    try:
        out_flat = build(_resident_single)(*args)
    except Exception:
        # Fallback: default double-buffering for the resident operands
        # (previously-verified-clean configuration).
        out_flat = build(_resident_default)(*args)

    # glue: the (B, 7, p_dim) view is a pure reshape, done outside the kernel.
    return out_flat[:B].reshape(B, 7, p_dim)


def init_params(key, ef_dim, p_dim):
    """Deterministic init matching the PyTorch module's shapes/schemes.

    Weights are stored [in_features, out_features] (transpose of torch)."""
    d_in = ef_dim * 8
    d_h1 = ef_dim * 16
    d_h2 = ef_dim * 32
    d_out = p_dim * 7

    k1, k2, k3 = jax.random.split(key, 3)

    def xavier_uniform(k, fan_in, fan_out):
        bound = math.sqrt(6.0 / (fan_in + fan_out))
        return jax.random.uniform(k, (fan_in, fan_out), jnp.float32,
                                  minval=-bound, maxval=bound)

    def xavier_normal(k, fan_in, fan_out):
        std = math.sqrt(2.0 / (fan_in + fan_out))
        return std * jax.random.normal(k, (fan_in, fan_out), jnp.float32)

    w1 = xavier_uniform(k1, d_in, d_h1)
    b1 = jnp.zeros((1, d_h1), jnp.float32)
    w2 = xavier_uniform(k2, d_h1, d_h2)
    b2 = jnp.zeros((1, d_h2), jnp.float32)
    w3 = xavier_normal(k3, d_h2, d_out)
    b3 = jnp.zeros((1, d_out), jnp.float32)
    return (w1, b1, w2, b2, w3, b3)


def reference_forward(x, params, p_dim):
    """Pure-JAX reference (same bf16 operand / f32 accumulation recipe)."""
    w1, b1, w2, b2, w3, b3 = params
    xb = x.astype(jnp.bfloat16)
    l1 = jnp.dot(xb, w1.astype(jnp.bfloat16),
                 preferred_element_type=jnp.float32) + b1
    l1 = jnp.where(l1 > 0, l1, 0.01 * l1)
    l2 = jnp.dot(l1.astype(jnp.bfloat16), w2.astype(jnp.bfloat16),
                 preferred_element_type=jnp.float32) + b2
    l2 = jnp.where(l2 > 0, l2, 0.01 * l2)
    l3 = jnp.dot(l2.astype(jnp.bfloat16), w3.astype(jnp.bfloat16),
                 preferred_element_type=jnp.float32) + b3
    l3 = l3.reshape(-1, 7, p_dim)
    return jnp.concatenate([jnp.abs(l3[:, :3, :]), l3[:, 3:, :]], axis=1)


if __name__ == "__main__":
    # Small shapes consistent with the module: ef_dim=8, p_dim=128, batch=4
    # -> 64 -> 128 -> 256 -> 7*128 = 896 features.
    ef_dim, p_dim, batch = 8, 128, 4

    key = jax.random.PRNGKey(0)
    k_params, k_x = jax.random.split(key)
    params = init_params(k_params, ef_dim, p_dim)
    x = jax.random.normal(k_x, (batch, ef_dim * 8), jnp.float32)

    out = decoder_forward(x, params, p_dim)
    out = jax.block_until_ready(out)

    ref = reference_forward(x, params, p_dim)
    assert out.shape == (batch, 7, p_dim), out.shape
    # bf16 matmul operands + bf16 output -> relaxed tolerance vs the matched
    # JAX reference (which stays in f32 at the output).
    assert jnp.allclose(out.astype(jnp.float32), ref, atol=3e-2, rtol=3e-2), \
        "mismatch vs reference"

    print("KERNEL_OK")
</pallas_src>

<mosaic_0001>
module attributes {stable_mosaic.version = 11 : i64} {
  func.func @_decoder_kernel(%arg0: i32, %arg1: memref<16x64xbf16, #tpu.memory_space<vmem>>, %arg2: memref<64x128xbf16, #tpu.memory_space<vmem>>, %arg3: memref<1x128xf32, #tpu.memory_space<vmem>>, %arg4: memref<128x256xbf16, #tpu.memory_space<vmem>>, %arg5: memref<1x256xf32, #tpu.memory_space<vmem>>, %arg6: memref<256x896xbf16, #tpu.memory_space<vmem>>, %arg7: memref<1x896xf32, #tpu.memory_space<vmem>>, %arg8: memref<16x896xbf16, #tpu.memory_space<vmem>>) attributes {dimension_semantics = [#tpu.dimension_semantics<parallel>], iteration_bounds = array<i64: 1>, scalar_prefetch = 0 : i64, scratch_operands = 0 : i64, tpu.core_type = #tpu.core_type<tc>, window_params = [{transform_indices = @transform_0, window_bounds = array<i64: 16, 64>}, {pipeline_mode = #tpu.pipeline_mode<synchronous>, transform_indices = @transform_1, window_bounds = array<i64: 64, 128>}, {pipeline_mode = #tpu.pipeline_mode<synchronous>, transform_indices = @transform_2, window_bounds = array<i64: 1, 128>}, {pipeline_mode = #tpu.pipeline_mode<synchronous>, transform_indices = @transform_3, window_bounds = array<i64: 128, 256>}, {pipeline_mode = #tpu.pipeline_mode<synchronous>, transform_indices = @transform_4, window_bounds = array<i64: 1, 256>}, {pipeline_mode = #tpu.pipeline_mode<synchronous>, transform_indices = @transform_5, window_bounds = array<i64: 256, 896>}, {pipeline_mode = #tpu.pipeline_mode<synchronous>, transform_indices = @transform_6, window_bounds = array<i64: 1, 896>}, {transform_indices = @transform_7, window_bounds = array<i64: 16, 896>}]} {
    %c0 = arith.constant 0 : index
    %c0_0 = arith.constant 0 : index
    %0 = vector.load %arg1[%c0, %c0_0] : memref<16x64xbf16, #tpu.memory_space<vmem>>, vector<16x64xbf16>
    %c0_1 = arith.constant 0 : index
    %c0_2 = arith.constant 0 : index
    %1 = vector.load %arg2[%c0_1, %c0_2] : memref<64x128xbf16, #tpu.memory_space<vmem>>, vector<64x128xbf16>
    %cst = arith.constant dense<0.000000e+00> : vector<16x128xf32>
    %2 = tpu.matmul %0, %1, %cst {dimension_numbers = #tpu.dot_dimension_numbers<[1], [0], [0], [1], [0, 0, 1, 1], [], []>} : vector<16x64xbf16>, vector<64x128xbf16>, vector<16x128xf32> -> vector<16x128xf32>
    %c0_3 = arith.constant 0 : index
    %c0_4 = arith.constant 0 : index
    %3 = vector.load %arg3[%c0_3, %c0_4] : memref<1x128xf32, #tpu.memory_space<vmem>>, vector<1x128xf32>
    %4 = vector.broadcast %3 : vector<1x128xf32> to vector<16x128xf32>
    %5 = arith.addf %2, %4 : vector<16x128xf32>
    %cst_5 = arith.constant 0.00999999977 : f32
    %6 = vector.broadcast %cst_5 : f32 to vector<16x128xf32>
    %7 = arith.mulf %6, %5 : vector<16x128xf32>
    %8 = arith.maximumf %5, %7 : vector<16x128xf32>
    %9 = arith.truncf %8 : vector<16x128xf32> to vector<16x128xbf16>
    %c0_6 = arith.constant 0 : index
    %c0_7 = arith.constant 0 : index
    %10 = vector.load %arg4[%c0_6, %c0_7] : memref<128x256xbf16, #tpu.memory_space<vmem>>, vector<128x256xbf16>
    %cst_8 = arith.constant dense<0.000000e+00> : vector<16x256xf32>
    %11 = tpu.matmul %9, %10, %cst_8 {dimension_numbers = #tpu.dot_dimension_numbers<[1], [0], [0], [1], [0, 0, 1, 1], [], []>} : vector<16x128xbf16>, vector<128x256xbf16>, vector<16x256xf32> -> vector<16x256xf32>
    %c0_9 = arith.constant 0 : index
    %c0_10 = arith.constant 0 : index
    %12 = vector.load %arg5[%c0_9, %c0_10] : memref<1x256xf32, #tpu.memory_space<vmem>>, vector<1x256xf32>
    %13 = vector.broadcast %12 : vector<1x256xf32> to vector<16x256xf32>
    %14 = arith.addf %11, %13 : vector<16x256xf32>
    %cst_11 = arith.constant 0.00999999977 : f32
    %15 = vector.broadcast %cst_11 : f32 to vector<16x256xf32>
    %16 = arith.mulf %15, %14 : vector<16x256xf32>
    %17 = arith.maximumf %14, %16 : vector<16x256xf32>
    %18 = arith.truncf %17 : vector<16x256xf32> to vector<16x256xbf16>
    %c0_12 = arith.constant 0 : index
    %c0_13 = arith.constant 0 : index
    %19 = vector.load %arg6[%c0_12, %c0_13] : memref<256x896xbf16, #tpu.memory_space<vmem>>, vector<256x896xbf16>
    %cst_14 = arith.constant dense<0.000000e+00> : vector<16x896xf32>
    %20 = tpu.matmul %18, %19, %cst_14 {dimension_numbers = #tpu.dot_dimension_numbers<[1], [0], [0], [1], [0, 0, 1, 1], [], []>} : vector<16x256xbf16>, vector<256x896xbf16>, vector<16x896xf32> -> vector<16x896xf32>
    %c0_15 = arith.constant 0 : index
    %c0_16 = arith.constant 0 : index
    %21 = vector.load %arg7[%c0_15, %c0_16] : memref<1x896xf32, #tpu.memory_space<vmem>>, vector<1x896xf32>
    %22 = vector.broadcast %21 : vector<1x896xf32> to vector<16x896xf32>
    %23 = arith.addf %20, %22 : vector<16x896xf32>
    %24 = vector.extract_strided_slice %23 {offsets = [0, 0], sizes = [16, 384], strides = [1, 1]} : vector<16x896xf32> to vector<16x384xf32>
    %25 = math.absf %24 : vector<16x384xf32>
    %26 = arith.truncf %25 : vector<16x384xf32> to vector<16x384xbf16>
    %c0_17 = arith.constant 0 : index
    %c0_18 = arith.constant 0 : index
    %27 = vector.load %arg8[%c0_17, %c0_18] : memref<16x896xbf16, #tpu.memory_space<vmem>>, vector<16x384xbf16>
    tpu.vector_store %arg8[%c0_17, %c0_18], %26 {strides = array<i32>} : memref<16x896xbf16, #tpu.memory_space<vmem>>, vector<16x384xbf16>,
    %28 = vector.extract_strided_slice %23 {offsets = [0, 384], sizes = [16, 512], strides = [1, 1]} : vector<16x896xf32> to vector<16x512xf32>
    %29 = arith.truncf %28 : vector<16x512xf32> to vector<16x512xbf16>
    %c0_19 = arith.constant 0 : index
    %c384 = arith.constant 384 : index
    %30 = vector.load %arg8[%c0_19, %c384] : memref<16x896xbf16, #tpu.memory_space<vmem>>, vector<16x512xbf16>
    tpu.vector_store %arg8[%c0_19, %c384], %29 {strides = array<i32>} : memref<16x896xbf16, #tpu.memory_space<vmem>>, vector<16x512xbf16>,
    return
  }
  func.func @transform_0(%arg0: i32) -> (i32, i32) {
    %c0_i32 = arith.constant 0 : i32
    %c0_i32_0 = arith.constant 0 : i32
    return %arg0, %c0_i32 : i32, i32
  }
  func.func @transform_1(%arg0: i32) -> (i32, i32) {
    %c0_i32 = arith.constant 0 : i32
    %c0_i32_0 = arith.constant 0 : i32
    %c0_i32_1 = arith.constant 0 : i32
    return %c0_i32, %c0_i32_0 : i32, i32
  }
  func.func @transform_2(%arg0: i32) -> (i32, i32) {
    %c0_i32 = arith.constant 0 : i32
    %c0_i32_0 = arith.constant 0 : i32
    %c0_i32_1 = arith.constant 0 : i32
    return %c0_i32, %c0_i32_0 : i32, i32
  }
  func.func @transform_3(%arg0: i32) -> (i32, i32) {
    %c0_i32 = arith.constant 0 : i32
    %c0_i32_0 = arith.constant 0 : i32
    %c0_i32_1 = arith.constant 0 : i32
    return %c0_i32, %c0_i32_0 : i32, i32
  }
  func.func @transform_4(%arg0: i32) -> (i32, i32) {
    %c0_i32 = arith.constant 0 : i32
    %c0_i32_0 = arith.constant 0 : i32
    %c0_i32_1 = arith.constant 0 : i32
    return %c0_i32, %c0_i32_0 : i32, i32
  }
  func.func @transform_5(%arg0: i32) -> (i32, i32) {
    %c0_i32 = arith.constant 0 : i32
    %c0_i32_0 = arith.constant 0 : i32
    %c0_i32_1 = arith.constant 0 : i32
    return %c0_i32, %c0_i32_0 : i32, i32
  }
  func.func @transform_6(%arg0: i32) -> (i32, i32) {
    %c0_i32 = arith.constant 0 : i32
    %c0_i32_0 = arith.constant 0 : i32
    %c0_i32_1 = arith.constant 0 : i32
    return %c0_i32, %c0_i32_0 : i32, i32
  }
  func.func @transform_7(%arg0: i32) -> (i32, i32) {
    %c0_i32 = arith.constant 0 : i32
    %c0_i32_0 = arith.constant 0 : i32
    return %arg0, %c0_i32 : i32, i32
  }
}

module attributes {stable_mosaic.version = 11 : i64} {
  func.func @_decoder_kernel(%arg0: i32, %arg1: memref<16x64xbf16, #tpu.memory_space<vmem>>, %arg2: memref<64x128xbf16, #tpu.memory_space<vmem>>, %arg3: memref<1x128xf32, #tpu.memory_space<vmem>>, %arg4: memref<128x256xbf16, #tpu.memory_space<vmem>>, %arg5: memref<1x256xf32, #tpu.memory_space<vmem>>, %arg6: memref<256x896xbf16, #tpu.memory_space<vmem>>, %arg7: memref<1x896xf32, #tpu.memory_space<vmem>>, %arg8: memref<16x896xbf16, #tpu.memory_space<vmem>>) attributes {dimension_semantics = [#tpu.dimension_semantics<parallel>], iteration_bounds = array<i64: 1>, scalar_prefetch = 0 : i64, scratch_operands = 0 : i64, tpu.core_type = #tpu.core_type<tc>, window_params = [{transform_indices = @transform_0, window_bounds = array<i64: 16, 64>}, {pipeline_mode = #tpu.pipeline_mode<synchronous>, transform_indices = @transform_1, window_bounds = array<i64: 64, 128>}, {pipeline_mode = #tpu.pipeline_mode<synchronous>, transform_indices = @transform_2, window_bounds = array<i64: 1, 128>}, {pipeline_mode = #tpu.pipeline_mode<synchronous>, transform_indices = @transform_3, window_bounds = array<i64: 128, 256>}, {pipeline_mode = #tpu.pipeline_mode<synchronous>, transform_indices = @transform_4, window_bounds = array<i64: 1, 256>}, {pipeline_mode = #tpu.pipeline_mode<synchronous>, transform_indices = @transform_5, window_bounds = array<i64: 256, 896>}, {pipeline_mode = #tpu.pipeline_mode<synchronous>, transform_indices = @transform_6, window_bounds = array<i64: 1, 896>}, {transform_indices = @transform_7, window_bounds = array<i64: 16, 896>}]} {
    %c0 = arith.constant 0 : index
    %c0_0 = arith.constant 0 : index
    %0 = vector.load %arg1[%c0, %c0_0] : memref<16x64xbf16, #tpu.memory_space<vmem>>, vector<16x64xbf16>
    %c0_1 = arith.constant 0 : index
    %c0_2 = arith.constant 0 : index
    %1 = vector.load %arg2[%c0_1, %c0_2] : memref<64x128xbf16, #tpu.memory_space<vmem>>, vector<64x128xbf16>
    %cst = arith.constant dense<0.000000e+00> : vector<16x128xf32>
    %2 = tpu.matmul %0, %1, %cst {dimension_numbers = #tpu.dot_dimension_numbers<[1], [0], [0], [1], [0, 0, 1, 1], [], []>} : vector<16x64xbf16>, vector<64x128xbf16>, vector<16x128xf32> -> vector<16x128xf32>
    %c0_3 = arith.constant 0 : index
    %c0_4 = arith.constant 0 : index
    %3 = vector.load %arg3[%c0_3, %c0_4] : memref<1x128xf32, #tpu.memory_space<vmem>>, vector<1x128xf32>
    %4 = vector.broadcast %3 : vector<1x128xf32> to vector<16x128xf32>
    %5 = arith.addf %2, %4 : vector<16x128xf32>
    %cst_5 = arith.constant 0.00999999977 : f32
    %6 = vector.broadcast %cst_5 : f32 to vector<16x128xf32>
    %7 = arith.mulf %6, %5 : vector<16x128xf32>
    %8 = arith.maximumf %5, %7 : vector<16x128xf32>
    %9 = arith.truncf %8 : vector<16x128xf32> to vector<16x128xbf16>
    %c0_6 = arith.constant 0 : index
    %c0_7 = arith.constant 0 : index
    %10 = vector.load %arg4[%c0_6, %c0_7] : memref<128x256xbf16, #tpu.memory_space<vmem>>, vector<128x256xbf16>
    %cst_8 = arith.constant dense<0.000000e+00> : vector<16x256xf32>
    %11 = tpu.matmul %9, %10, %cst_8 {dimension_numbers = #tpu.dot_dimension_numbers<[1], [0], [0], [1], [0, 0, 1, 1], [], []>} : vector<16x128xbf16>, vector<128x256xbf16>, vector<16x256xf32> -> vector<16x256xf32>
    %c0_9 = arith.constant 0 : index
    %c0_10 = arith.constant 0 : index
    %12 = vector.load %arg5[%c0_9, %c0_10] : memref<1x256xf32, #tpu.memory_space<vmem>>, vector<1x256xf32>
    %13 = vector.broadcast %12 : vector<1x256xf32> to vector<16x256xf32>
    %14 = arith.addf %11, %13 : vector<16x256xf32>
    %cst_11 = arith.constant 0.00999999977 : f32
    %15 = vector.broadcast %cst_11 : f32 to vector<16x256xf32>
    %16 = arith.mulf %15, %14 : vector<16x256xf32>
    %17 = arith.maximumf %14, %16 : vector<16x256xf32>
    %18 = arith.truncf %17 : vector<16x256xf32> to vector<16x256xbf16>
    %c0_12 = arith.constant 0 : index
    %c0_13 = arith.constant 0 : index
    %19 = vector.load %arg6[%c0_12, %c0_13] : memref<256x896xbf16, #tpu.memory_space<vmem>>, vector<256x896xbf16>
    %cst_14 = arith.constant dense<0.000000e+00> : vector<16x896xf32>
    %20 = tpu.matmul %18, %19, %cst_14 {dimension_numbers = #tpu.dot_dimension_numbers<[1], [0], [0], [1], [0, 0, 1, 1], [], []>} : vector<16x256xbf16>, vector<256x896xbf16>, vector<16x896xf32> -> vector<16x896xf32>
    %c0_15 = arith.constant 0 : index
    %c0_16 = arith.constant 0 : index
    %21 = vector.load %arg7[%c0_15, %c0_16] : memref<1x896xf32, #tpu.memory_space<vmem>>, vector<1x896xf32>
    %22 = vector.broadcast %21 : vector<1x896xf32> to vector<16x896xf32>
    %23 = arith.addf %20, %22 : vector<16x896xf32>
    %24 = vector.extract_strided_slice %23 {offsets = [0, 0], sizes = [16, 384], strides = [1, 1]} : vector<16x896xf32> to vector<16x384xf32>
    %25 = math.absf %24 : vector<16x384xf32>
    %26 = arith.truncf %25 : vector<16x384xf32> to vector<16x384xbf16>
    %c0_17 = arith.constant 0 : index
    %c0_18 = arith.constant 0 : index
    %27 = vector.load %arg8[%c0_17, %c0_18] : memref<16x896xbf16, #tpu.memory_space<vmem>>, vector<16x384xbf16>
    tpu.vector_store %arg8[%c0_17, %c0_18], %26 {strides = array<i32>} : memref<16x896xbf16, #tpu.memory_space<vmem>>, vector<16x384xbf16>,
    %28 = vector.extract_strided_slice %23 {offsets = [0, 384], sizes = [16, 512], strides = [1, 1]} : vector<16x896xf32> to vector<16x512xf32>
    %29 = arith.truncf %28 : vector<16x512xf32> to vector<16x512xbf16>
    %c0_19 = arith.constant 0 : index
    %c384 = arith.constant 384 : index
    %30 = vector.load %arg8[%c0_19, %c384] : memref<16x896xbf16, #tpu.memory_space<vmem>>, vector<16x512xbf16>
    tpu.vector_store %arg8[%c0_19, %c384], %29 {strides = array<i32>} : memref<16x896xbf16, #tpu.memory_space<vmem>>, vector<16x512xbf16>,
    return
  }
  func.func @transform_0(%arg0: i32) -> (i32, i32) {
    %c0_i32 = arith.constant 0 : i32
    %c0_i32_0 = arith.constant 0 : i32
    return %arg0, %c0_i32 : i32, i32
  }
  func.func @transform_1(%arg0: i32) -> (i32, i32) {
    %c0_i32 = arith.constant 0 : i32
    %c0_i32_0 = arith.constant 0 : i32
    %c0_i32_1 = arith.constant 0 : i32
    return %c0_i32, %c0_i32_0 : i32, i32
  }
  func.func @transform_2(%arg0: i32) -> (i32, i32) {
    %c0_i32 = arith.constant 0 : i32
    %c0_i32_0 = arith.constant 0 : i32
    %c0_i32_1 = arith.constant 0 : i32
    return %c0_i32, %c0_i32_0 : i32, i32
  }
  func.func @transform_3(%arg0: i32) -> (i32, i32) {
    %c0_i32 = arith.constant 0 : i32
    %c0_i32_0 = arith.constant 0 : i32
    %c0_i32_1 = arith.constant 0 : i32
    return %c0_i32, %c0_i32_0 : i32, i32
  }
  func.func @transform_4(%arg0: i32) -> (i32, i32) {
    %c0_i32 = arith.constant 0 : i32
    %c0_i32_0 = arith.constant 0 : i32
    %c0_i32_1 = arith.constant 0 : i32
    return %c0_i32, %c0_i32_0 : i32, i32
  }
  func.func @transform_5(%arg0: i32) -> (i32, i32) {
    %c0_i32 = arith.constant 0 : i32
    %c0_i32_0 = arith.constant 0 : i32
    %c0_i32_1 = arith.constant 0 : i32
    return %c0_i32, %c0_i32_0 : i32, i32
  }
  func.func @transform_6(%arg0: i32) -> (i32, i32) {
    %c0_i32 = arith.constant 0 : i32
    %c0_i32_0 = arith.constant 0 : i32
    %c0_i32_1 = arith.constant 0 : i32
    return %c0_i32, %c0_i32_0 : i32, i32
  }
  func.func @transform_7(%arg0: i32) -> (i32, i32) {
    %c0_i32 = arith.constant 0 : i32
    %c0_i32_0 = arith.constant 0 : i32
    return %arg0, %c0_i32 : i32, i32
  }
}

</mosaic_0001>

<bundles_post_ra>
// kernel: tpu_custom_call.1
= control target key start
LH: loop header
LB: loop body
LE: loop exit
PB: predicated region body
PF: predicated region fallthrough
CT: control target
= control target key end

     0   :  { %12 = vsyncpa [#allocation3], 0  ;;  %s1936_s0 = inlined_call_operand.hbm [shape: bf16[16,64], index: 0, kind: input, shape index: {}]   ;;  %s1937_s1 = inlined_call_operand.hbm [shape: bf16[64,128], index: 1, kind: input, shape index: {}]   ;;  %s1938_s2 = inlined_call_operand.vmem [shape: f32[1,128], index: 2, kind: input, shape index: {}]   ;;  %s1939_s3 = inlined_call_operand.hbm [shape: bf16[128,256], index: 3, kind: input, shape index: {}]   ;;  %s1940_s4 = inlined_call_operand.vmem [shape: f32[1,256], index: 4, kind: input, shape index: {}]   ;;  %s1941_s5 = inlined_call_operand.hbm [shape: bf16[256,896], index: 5, kind: input, shape index: {}]   ;;  %s1942_s6 = inlined_call_operand.vmem [shape: f32[1,896], index: 6, kind: input, shape index: {}]   ;;  %s1943_s7 = inlined_call_operand.hbm [shape: bf16[16,896], index: 7, kind: output, shape index: {}]  }
   0x1   :  { %13 = vsyncpa [#allocation6], 0 }
   0x2   :  { %14 = vsyncpa [#allocation9], 0 }
   0x3   :  { %15 = vsyncpa [#allocation4], 0  ;;  %s1829_s24 = smov [#allocation5]   ;;  %s1830_s26 = smov [#allocation2]  }
   0x4   :  { %s33_s25 = sshll.u32 %s1829_s24, 4  ;;  %s21_s27 = sshll.u32 %s1830_s26, 4  ;;  %s34_s25 = int_to_ptr.vmem [resolvable:$true] %s33_s25  ;;  %s22_s27 = int_to_ptr.vmem [resolvable:$true] %s21_s27 }
   0x5   :  { %s1729_s28 = scalar_lea.vmem %s34_s25, 512  ;;  %p1734_p1 = scmp.lt.s32.totalorder %s34_s25, %s34_s25 }
   0x6   :  { %p1730_p0 = scmp.ne.s32.totalorder %s34_s25, %s1729_s28  ;;  %p1735_p2 = scmp.lt.s32.totalorder %s1729_s28, %s1729_s28 }
   0x8   :  { %p1736_p3 = por %p1735_p2, %p1734_p1 }
   0xa   :  { %p1737_p4 = pnand %p1736_p3, %p1730_p0 }
   0xc   :  { %1740 = shalt.err (!%p1737_p4)
}
   0xd   :  { %s1831_s29 = smov 64   ;;  %s1832_s30 = smov 4  }
   0xe   :  { %39 = dma.hbm_to_vmem [thread:$0]  %s1937_s1, 512, %s34_s25, [#allocation6], %s1831_s29, %s1831_s29, %s1832_s30  }
   0xf   :  { %s1749_s10 = scalar_lea.vmem %s22_s27, 128  ;;  %p1754_p6 = scmp.lt.s32.totalorder %s22_s27, %s22_s27 }
  0x10   :  { %p1750_p5 = scmp.ne.s32.totalorder %s22_s27, %s1749_s10  ;;  %p1755_p7 = scmp.lt.s32.totalorder %s1749_s10, %s1749_s10 }
  0x12   :  { %p1756_p8 = por %p1755_p7, %p1754_p6 }
  0x14   :  { %p1757_p9 = pnand %p1756_p8, %p1750_p5 }
  0x16   :  { %1760 = shalt.err (!%p1757_p9)
}
  0x17   :  { %27 = dma.hbm_to_vmem [thread:$0]  %s1936_s0, 128, %s22_s27, [#allocation3], %s1831_s29, %s1831_s29, %s1832_s30  }
  0x18   :  { %s1833_s13 = smov [#allocation7]  }
  0x19   :  { %s47_s14 = sshll.u32 %s1833_s13, 4  ;;  %s48_s14 = int_to_ptr.vmem [resolvable:$true] %s47_s14 }
  0x1a   :  { %s1769_s15 = scalar_lea.vmem %s48_s14, 2048  ;;  %p1774_p11 = scmp.lt.s32.totalorder %s48_s14, %s48_s14 }
  0x1b   :  { %p1770_p10 = scmp.ne.s32.totalorder %s48_s14, %s1769_s15  ;;  %p1775_p12 = scmp.lt.s32.totalorder %s1769_s15, %s1769_s15 }
  0x1d   :  { %p1776_p13 = por %p1775_p12, %p1774_p11 }
  0x1f   :  { %p1777_p0 = pnand %p1776_p13, %p1770_p10 }
  0x21   :  { %1780 = shalt.err (!%p1777_p0)
}
  0x22   :  { %s1834_s1 = smov 128   ;;  %s1835_s16 = smov 8  }
  0x23   :  { %53 = dma.hbm_to_vmem [thread:$0]  %s1939_s3, 2048, %s48_s14, [#allocation6], %s1834_s1, %s1834_s1, %s1835_s16  }
  0x24   :  { %s1836_s19 = smov [#allocation8]  }
  0x25   :  { %s61_s20 = sshll.u32 %s1836_s19, 4  ;;  %s62_s20 = int_to_ptr.vmem [resolvable:$true] %s61_s20 }
  0x26   :  { %s1789_s0 = scalar_lea.vmem %s62_s20, 14336  ;;  %p1794_p2 = scmp.lt.s32.totalorder %s62_s20, %s62_s20 }
  0x27   :  { %p1790_p1 = scmp.ne.s32.totalorder %s62_s20, %s1789_s0  ;;  %p1795_p3 = scmp.lt.s32.totalorder %s1789_s0, %s1789_s0 }
  0x29   :  { %p1796_p4 = por %p1795_p3, %p1794_p2 }
  0x2b   :  { %p1797_p5 = pnand %p1796_p4, %p1790_p1 }
  0x2d   :  { %1800 = shalt.err (!%p1797_p5)
}
  0x2e   :  { %s1837_s21 = smov 448   ;;  %s1838_s22 = smov 28  }
  0x2f   :  { %67 = dma.hbm_to_vmem [thread:$0]  %s1941_s5, 14336, %s62_s20, [#allocation9], %s1837_s21, %s1837_s21, %s1838_s22  }
  0x30   :  { %1821 = dma.done.wait [#allocation3], 128  }
  0x31   :  { %1822 = vsyncadd [#allocation3], 4294967168 }
  0x32   :  { %1823 = dma.done.wait [#allocation6], 2560  }
  0x33   :  { %1824 = vsyncadd [#allocation6], 4294964736 }
  0x34   :  { %1825 = dma.done.wait [#allocation9], 14336  }
  0x35   :  { %1826 = vsyncadd [#allocation9], 4294952960  ;;  %v1839_v0 = vmov 0.0   ;;  %vm1840_vm0 = vmmov 0   ;;  %v1532_v1 = vld [vmem:[#allocation5 + $0x18] sm:$0xff]   ;;  %v1533_v2 = vld [vmem:[#allocation5 + $0x10] sm:$0xff]  }
  0x36   :  { %1506 = vmatprep.subr.bf16.mxu0 %v1839_v0  ;;  %1514 = vmatprep.mubr.msk.bf16.mxu0 %vm1840_vm0, %v1839_v0  ;;  %v1534_v3 = vld [vmem:[#allocation5 + $0x8] sm:$0xff]   ;;  %v1537_v4 = vld [vmem:[#allocation7 + $0x74] ss:$8 sps:$4 sm:$0xff]   ;;  %v1539_v5 = vld [vmem:[#allocation7 + $0x70] ss:$8 sps:$4 sm:$0xff]   ;;  %vm129_vm1 = vcmask 523264  }
  0x37   :  { %1507 = vmatpush3.bf16.msra.mxu0 %v1532_v1  ;;  %287 = vmatprep.subr.bf16.mxu1 %v1537_v4  ;;  %v1540_v6 = vld [vmem:[#allocation7 + $0x64] ss:$8 sps:$4 sm:$0xff]   ;;  %v1542_v7 = vld [vmem:[#allocation7 + $0x60] ss:$8 sps:$4 sm:$0xff]   ;;  %v1543_v8 = vld [vmem:[#allocation7 + $0x54] ss:$8 sps:$4 sm:$0xff]  }
  0x38   :  { %1508 = vmatprep.subr.bf16.mxu0 %v1839_v0  ;;  %288 = vmatpush1.bf16.msra.mxu1 %v1539_v5  ;;  %v1535_v9 = vld [vmem:[#allocation5] sm:$0xff]   ;;  %v1536_v10 = vld [vmem:[#allocation2] sm:$0xff]   ;;  %v1841_v22 = vmov 0   ;;  %v1563_v24 = vld [vmem:[#allocation8 + $0x18c] ss:$28 sps:$4 sm:$0xff]  }
  0x39   :  { %289 = vmatprep.subr.bf16.mxu1 %v1540_v6  ;;  %v1545_v11 = vld [vmem:[#allocation7 + $0x50] ss:$8 sps:$4 sm:$0xff]   ;;  %v1546_v12 = vld [vmem:[#allocation7 + $0x44] ss:$8 sps:$4 sm:$0xff]   ;;  %v1548_v13 = vld [vmem:[#allocation7 + $0x40] ss:$8 sps:$4 sm:$0xff]   ;;  %319 = vmatprep.mubr.bf16.mxu1 %v1841_v22 }
  0x3a   :  { %v1549_v14 = vld [vmem:[#allocation7 + $0x34] ss:$8 sps:$4 sm:$0xff]   ;;  %v1551_v15 = vld [vmem:[#allocation7 + $0x30] ss:$8 sps:$4 sm:$0xff]   ;;  %v1552_v16 = vld [vmem:[#allocation7 + $0x24] ss:$8 sps:$4 sm:$0xff]  }
  0x3b   :  { %1509 = vmatpush3.bf16.msra.mxu0 %v1533_v2  ;;  %v1554_v17 = vld [vmem:[#allocation7 + $0x20] ss:$8 sps:$4 sm:$0xff]   ;;  %v1555_v18 = vld [vmem:[#allocation7 + $0x14] ss:$8 sps:$4 sm:$0xff]   ;;  %v1557_v19 = vld [vmem:[#allocation7 + $0x10] ss:$8 sps:$4 sm:$0xff]  }
  0x3c   :  { %1510 = vmatprep.subr.bf16.mxu0 %v1839_v0  ;;  %290 = vmatpush1.bf16.msra.mxu1 %v1542_v7  ;;  %v1558_v20 = vld [vmem:[#allocation7 + $0x4] ss:$8 sps:$4 sm:$0xff]   ;;  %v1560_v21 = vld [vmem:[#allocation7] ss:$8 sps:$4 sm:$0xff]   ;;  %v1566_v25 = vld [vmem:[#allocation8 + $0x194] ss:$28 sps:$4 sm:$0xff]  }
  0x3d   :  { %291 = vmatprep.subr.bf16.mxu1 %v1543_v8  ;;  %v1561_v23 = vld [vmem:[#allocation8 + $0x188] ss:$28 sps:$4 sm:$0xff]   ;;  %v1569_v26 = vld [vmem:[#allocation8 + $0x154] ss:$28 sps:$4 sm:$0xff]   ;;  %v1575_v28 = vld [vmem:[#allocation8 + $0x11c] ss:$28 sps:$4 sm:$0xff]  }
  0x3e   :  { %v1567_v27 = vld [vmem:[#allocation8 + $0x150] ss:$28 sps:$4 sm:$0xff]   ;;  %v1573_v29 = vld [vmem:[#allocation8 + $0x118] ss:$28 sps:$4 sm:$0xff]   ;;  %v1581_v30 = vld [vmem:[#allocation8 + $0xe4] ss:$28 sps:$4 sm:$0xff]  }
  0x3f   :  { %1511 = vmatpush3.bf16.msra.mxu0 %v1534_v3  ;;  %v1579_v31 = vld [vmem:[#allocation8 + $0xe0] ss:$28 sps:$4 sm:$0xff]   ;;  %v1587_v32 = vld [vmem:[#allocation8 + $0xac] ss:$28 sps:$4 sm:$0xff]   ;;  %v1593_v34 = vld [vmem:[#allocation8 + $0x74] ss:$28 sps:$4 sm:$0xff]  }
  0x40   :  { %1512 = vmatprep.subr.bf16.mxu0 %v1839_v0  ;;  %292 = vmatpush1.bf16.msra.mxu1 %v1545_v11  ;;  %v1585_v33 = vld [vmem:[#allocation8 + $0xa8] ss:$28 sps:$4 sm:$0xff]   ;;  %v1591_v35 = vld [vmem:[#allocation8 + $0x70] ss:$28 sps:$4 sm:$0xff]   ;;  %v1599_v36 = vld [vmem:[#allocation8 + $0x3c] ss:$28 sps:$4 sm:$0xff]  }
  0x41   :  { %293 = vmatprep.subr.bf16.mxu1 %v1546_v12  ;;  %v1597_v37 = vld [vmem:[#allocation8 + $0x38] ss:$28 sps:$4 sm:$0xff]   ;;  %v1605_v38 = vld [vmem:[#allocation8 + $0x4] ss:$28 sps:$4 sm:$0xff]   ;;  %v1611_v40 = vld [vmem:[#allocation8 + $0x34c] ss:$28 sps:$4 sm:$0xff]  }
  0x42   :  { %v1603_v39 = vld [vmem:[#allocation8] ss:$28 sps:$4 sm:$0xff]   ;;  %v1609_v41 = vld [vmem:[#allocation8 + $0x348] ss:$28 sps:$4 sm:$0xff]   ;;  %v1617_v42 = vld [vmem:[#allocation8 + $0x314] ss:$28 sps:$4 sm:$0xff]  }
  0x43   :  { %1513 = vmatpush3.bf16.msra.mxu0 %v1535_v9  ;;  %v1615_v43 = vld [vmem:[#allocation8 + $0x310] ss:$28 sps:$4 sm:$0xff]   ;;  %v1623_v44 = vld [vmem:[#allocation8 + $0x2dc] ss:$28 sps:$4 sm:$0xff]   ;;  %v1629_v46 = vld [vmem:[#allocation8 + $0x2a4] ss:$28 sps:$4 sm:$0xff]  }
  0x44   :  { %294 = vmatpush1.bf16.msra.mxu1 %v1548_v13  ;;  %1081 = vmatprep.subr.bf16.mxu0 %v1563_v24  ;;  %v1621_v45 = vld [vmem:[#allocation8 + $0x2d8] ss:$28 sps:$4 sm:$0xff]   ;;  %v1627_v47 = vld [vmem:[#allocation8 + $0x2a0] ss:$28 sps:$4 sm:$0xff]   ;;  %v1635_v48 = vld [vmem:[#allocation8 + $0x26c] ss:$28 sps:$4 sm:$0xff]  }
  0x45   :  { %295 = vmatprep.subr.bf16.mxu1 %v1549_v14  ;;  %v1633_v49 = vld [vmem:[#allocation8 + $0x268] ss:$28 sps:$4 sm:$0xff]   ;;  %v1328_v50 = vld [vmem:[%s1938_s2] ss:$0 sm:$0xff]  ;;  %v1564_v61 = vld [vmem:[#allocation8 + $0x190] ss:$28 sps:$4 sm:$0xff]  }
  0x46   :  { %1515 = vmatmul.mubr.msk.bf16.vlgmr.msra.gmra.mxu0 %vm129_vm1, %v1536_v10  ;;  %v1572_v63 = vld [vmem:[#allocation8 + $0x15c] ss:$28 sps:$4 sm:$0xff]   ;;  %v1578_v1 = vld [vmem:[#allocation8 + $0x124] ss:$28 sps:$4 sm:$0xff]   ;;  %v1584_v3 = vld [vmem:[#allocation8 + $0xec] ss:$28 sps:$4 sm:$0xff]  }
  0x47   :  { %1082 = vmatpush1.bf16.msra.mxu0 %v1561_v23  ;;  %v1570_v0 = vld [vmem:[#allocation8 + $0x158] ss:$28 sps:$4 sm:$0xff]   ;;  %v1576_v2 = vld [vmem:[#allocation8 + $0x120] ss:$28 sps:$4 sm:$0xff]   ;;  %v1582_v4 = vld [vmem:[#allocation8 + $0xe8] ss:$28 sps:$4 sm:$0xff]  }
  0x48   :  { %296 = vmatpush1.bf16.msra.mxu1 %v1551_v15  ;;  %1083 = vmatprep.subr.bf16.mxu0 %v1569_v26  ;;  %v1590_v5 = vld [vmem:[#allocation8 + $0xb4] ss:$28 sps:$4 sm:$0xff]   ;;  %v1596_v7 = vld [vmem:[#allocation8 + $0x7c] ss:$28 sps:$4 sm:$0xff]   ;;  %v1602_v9 = vld [vmem:[#allocation8 + $0x44] ss:$28 sps:$4 sm:$0xff]  }
  0x49   :  { %297 = vmatprep.subr.bf16.mxu1 %v1552_v16  ;;  %v1588_v6 = vld [vmem:[#allocation8 + $0xb0] ss:$28 sps:$4 sm:$0xff]   ;;  %v1594_v8 = vld [vmem:[#allocation8 + $0x78] ss:$28 sps:$4 sm:$0xff]   ;;  %v1600_v10 = vld [vmem:[#allocation8 + $0x40] ss:$28 sps:$4 sm:$0xff]  }
  0x4a   :  { %v1608_v11 = vld [vmem:[#allocation8 + $0xc] ss:$28 sps:$4 sm:$0xff]   ;;  %v1614_v13 = vld [vmem:[#allocation8 + $0x354] ss:$28 sps:$4 sm:$0xff]   ;;  %v1620_v15 = vld [vmem:[#allocation8 + $0x31c] ss:$28 sps:$4 sm:$0xff]  }
  0x4b   :  { %1084 = vmatpush1.bf16.msra.mxu0 %v1567_v27  ;;  %v1606_v12 = vld [vmem:[#allocation8 + $0x8] ss:$28 sps:$4 sm:$0xff]   ;;  %v1612_v14 = vld [vmem:[#allocation8 + $0x350] ss:$28 sps:$4 sm:$0xff]   ;;  %v1618_v16 = vld [vmem:[#allocation8 + $0x318] ss:$28 sps:$4 sm:$0xff]  }
  0x4c   :  { %298 = vmatpush1.bf16.msra.mxu1 %v1554_v17  ;;  %1085 = vmatprep.subr.bf16.mxu0 %v1575_v28  ;;  %v1626_v17 = vld [vmem:[#allocation8 + $0x2e4] ss:$28 sps:$4 sm:$0xff]   ;;  %v1636_v22 = vld [vmem:[#allocation8 + $0x270] ss:$28 sps:$4 sm:$0xff]   ;;  %v1644_v24 = vld [vmem:[#allocation8 + $0x23c] ss:$28 sps:$4 sm:$0xff]  }
  0x4d   :  { %299 = vmatprep.subr.bf16.mxu1 %v1555_v18  ;;  %v1624_v18 = vld [vmem:[#allocation8 + $0x2e0] ss:$28 sps:$4 sm:$0xff]   ;;  %v1641_v23 = vld [vmem:[#allocation8 + $0x234] ss:$28 sps:$4 sm:$0xff]  }
  0x4e   :  { %v1642_v26 = vld [vmem:[#allocation8 + $0x238] ss:$28 sps:$4 sm:$0xff]   ;;  %v1650_v28 = vld [vmem:[#allocation8 + $0x204] ss:$28 sps:$4 sm:$0xff]  }
  0x4f   :  { %1086 = vmatpush1.bf16.msra.mxu0 %v1573_v29  ;;  %v1647_v27 = vld [vmem:[#allocation8 + $0x1fc] ss:$28 sps:$4 sm:$0xff]  }
  0x50   :  { %300 = vmatpush1.bf16.msra.mxu1 %v1557_v19  ;;  %1087 = vmatprep.subr.bf16.mxu0 %v1581_v30  ;;  %v1632_v19 = vld [vmem:[#allocation8 + $0x2ac] ss:$28 sps:$4 sm:$0xff]   ;;  %v1645_v29 = vld [vmem:[#allocation8 + $0x1f8] ss:$28 sps:$4 sm:$0xff]   ;;  %v1648_v30 = vld [vmem:[#allocation8 + $0x200] ss:$28 sps:$4 sm:$0xff]  }
  0x51   :  { %301 = vmatprep.subr.bf16.mxu1 %v1558_v20  ;;  %v1630_v20 = vld [vmem:[#allocation8 + $0x2a8] ss:$28 sps:$4 sm:$0xff]  }
  0x53   :  { %1088 = vmatpush1.bf16.msra.mxu0 %v1579_v31  ;;  %v1653_v31 = vld [vmem:[#allocation8 + $0x1c4] ss:$28 sps:$4 sm:$0xff]  }
  0x54   :  { %302 = vmatpush1.bf16.msra.mxu1 %v1560_v21  ;;  %1089 = vmatprep.subr.bf16.mxu0 %v1587_v32  ;;  %v1638_v21 = vld [vmem:[#allocation8 + $0x274] ss:$28 sps:$4 sm:$0xff]   ;;  %v1656_v32 = vld [vmem:[#allocation8 + $0x1cc] ss:$28 sps:$4 sm:$0xff]  }
  0x55   :  { %1124 = vmatprep.subr.bf16.mxu1 %v1566_v25  ;;  %v1639_v25 = vld [vmem:[#allocation8 + $0x230] ss:$28 sps:$4 sm:$0xff]  }
  0x57   :  { %1090 = vmatpush1.bf16.msra.mxu0 %v1585_v33  ;;  %v1651_v33 = vld [vmem:[#allocation8 + $0x1c0] ss:$28 sps:$4 sm:$0xff]  }
  0x58   :  { %1091 = vmatprep.subr.bf16.mxu0 %v1593_v34  ;;  %v1654_v34 = vld [vmem:[#allocation8 + $0x1c8] ss:$28 sps:$4 sm:$0xff]  }
  0x5b   :  { %1092 = vmatpush1.bf16.msra.mxu0 %v1591_v35  ;;  %v1659_v35 = vld [vmem:[#allocation8 + $0x19c] ss:$28 sps:$4 sm:$0xff]  }
  0x5c   :  { %1093 = vmatprep.subr.bf16.mxu0 %v1599_v36  ;;  %v1660_v36 = vld [vmem:[#allocation8 + $0x360] ss:$28 sps:$4 sm:$0xff]  }
  0x5f   :  { %1094 = vmatpush1.bf16.msra.mxu0 %v1597_v37  ;;  %v197_v37 = vlaneseq }
  0x60   :  { %1095 = vmatprep.subr.bf16.mxu0 %v1605_v38 }
  0x61   :  { %v1901_v38 = vshrl.u32 %v197_v37, 7  ;;  %v1709_v37 = vld [vmem:[#allocation8 + $0x278] ss:$28 sps:$4 sm:$0xff]  }
  0x63   :  { %1096 = vmatpush1.bf16.msra.mxu0 %v1603_v39  ;;  %v203_v39 = vsub.s32 1, %v1901_v38 }
  0x64   :  { %1097 = vmatprep.subr.bf16.mxu0 %v1611_v40  ;;  %v199_v40 = vsub.s32 0, %v1901_v38 }
  0x67   :  { %1098 = vmatpush2.bf16.msra.mxu0 %v1609_v41  ;;  %v195_v41 = vld [vmem:[%s1940_s4] sm:$0x3] }
  0x68   :  { %1099 = vmatprep.subr.bf16.mxu0 %v1617_v42  ;;  %v204_v42 = vrot.slane %v195_v41, %v203_v39 }
  0x6b   :  { %1100 = vmatpush2.bf16.msra.mxu0 %v1615_v43  ;;  %v200_v43 = vrot.slane %v195_v41, %v199_v40  ;;  %v1714_v41 = vld [vmem:[#allocation8 + $0x244] ss:$28 sps:$4 sm:$0xff]  }
  0x6c   :  { %1101 = vmatprep.subr.bf16.mxu0 %v1623_v44 }
  0x6f   :  { %1102 = vmatpush2.bf16.msra.mxu0 %v1621_v45 }
  0x70   :  { %1103 = vmatprep.subr.bf16.mxu0 %v1629_v46 }
  0x73   :  { %1104 = vmatpush2.bf16.msra.mxu0 %v1627_v47 }
  0x74   :  { %1105 = vmatprep.subr.bf16.mxu0 %v1635_v48 }
  0x77   :  { %1106 = vmatpush2.bf16.msra.mxu0 %v1633_v49 }
  0x78   :  { %1107 = vmatprep.subr.bf16.mxu0 %v1641_v23  ;;  %v1691_v23 = vld [vmem:[#allocation8 + $0x50] ss:$28 sps:$4 sm:$0xff]  }
  0x7b   :  { %1108 = vmatpush2.bf16.msra.mxu0 %v1639_v25  ;;  %v1695_v25 = vld [vmem:[#allocation8 + $0x1d8] ss:$28 sps:$4 sm:$0xff]  }
  0x7c   :  { %1109 = vmatprep.subr.bf16.mxu0 %v1647_v27  ;;  %v1696_v27 = vld [vmem:[#allocation8 + $0x18] ss:$28 sps:$4 sm:$0xff]  }
  0x7f   :  { %1110 = vmatpush2.bf16.msra.mxu0 %v1645_v29  ;;  %v1697_v29 = vld [vmem:[#allocation8 + $0x358] ss:$28 sps:$4 sm:$0xff]  }
  0x80   :  { %1111 = vmatprep.subr.bf16.mxu0 %v1653_v31  ;;  %v1700_v31 = vld [vmem:[#allocation8 + $0x320] ss:$28 sps:$4 sm:$0xff]  }
  0x83   :  { %1112 = vmatpush2.bf16.msra.mxu0 %v1651_v33  ;;  %v1703_v33 = vld [vmem:[#allocation8 + $0x2e8] ss:$28 sps:$4 sm:$0xff]  }
  0x84   :  { %1167 = vmatprep.subr.bf16.mxu0 %v1659_v35  ;;  %v1706_v35 = vld [vmem:[#allocation8 + $0x2b0] ss:$28 sps:$4 sm:$0xff]  }
 0x106   :  { %v167_v51 = vpop.f32.mrf.mxu0 }
 0x107   :  { %v168_v52 = vadd.f32 %v1328_v50, %v167_v51 }
 0x108   :  { %v1516_v53 = vpop.f32.mrf.mxu0 }
 0x109   :  { %v174_v55 = vmul.f32 0.01, %v168_v52 }
 0x10a   :  { %v170_v54 = vpop.f32.mrf.mxu0 }
 0x10b   :  { %v171_v56 = vadd.f32 %v1328_v50, %v170_v54  ;;  %v176_v59 = vmax.f32 %v168_v52, %v174_v55 }
 0x10c   :  { %v1517_v57 = vpop.f32.mrf.mxu0 }
 0x10d   :  { %v175_v58 = vmul.f32 0.01, %v171_v56 }
 0x10f   :  { %v177_v60 = vmax.f32 %v171_v56, %v175_v58 }
 0x111   :  { %v178_v62 = vpack.c.bf16 %v177_v60, %v176_v59 }
 0x113   :  { %320 = vmatmul.mubr.bf16.vlgmr.msra.gmra.mxu1 %v178_v62  ;;  %v1661_v62 = vld [vmem:[#allocation8 + $0x1a0] ss:$28 sps:$4 sm:$0xff]  }
 0x114   :  { %1125 = vmatpush1.bf16.msra.mxu1 %v1564_v61  ;;  %v1657_v61 = vld [vmem:[#allocation8 + $0x198] ss:$28 sps:$4 sm:$0xff]  }
 0x115   :  { %1126 = vmatprep.subr.bf16.mxu1 %v1572_v63 }
 0x118   :  { %1127 = vmatpush1.bf16.msra.mxu1 %v1570_v0  ;;  %v1664_v0 = vld [vmem:[#allocation8 + $0x164] ss:$28 sps:$4 sm:$0xff]  }
 0x119   :  { %1128 = vmatprep.subr.bf16.mxu1 %v1578_v1  ;;  %v1665_v1 = vld [vmem:[#allocation8 + $0x328] ss:$28 sps:$4 sm:$0xff]  }
 0x11c   :  { %1129 = vmatpush1.bf16.msra.mxu1 %v1576_v2  ;;  %v1662_v2 = vld [vmem:[#allocation8 + $0x160] ss:$28 sps:$4 sm:$0xff]  }
 0x11d   :  { %1130 = vmatprep.subr.bf16.mxu1 %v1584_v3  ;;  %v1666_v3 = vld [vmem:[#allocation8 + $0x168] ss:$28 sps:$4 sm:$0xff]  }
 0x120   :  { %1131 = vmatpush1.bf16.msra.mxu1 %v1582_v4  ;;  %v1669_v4 = vld [vmem:[#allocation8 + $0x12c] ss:$28 sps:$4 sm:$0xff]  }
 0x121   :  { %1132 = vmatprep.subr.bf16.mxu1 %v1590_v5  ;;  %v1670_v5 = vld [vmem:[#allocation8 + $0x2f0] ss:$28 sps:$4 sm:$0xff]  }
 0x124   :  { %1133 = vmatpush1.bf16.msra.mxu1 %v1588_v6  ;;  %v1667_v6 = vld [vmem:[#allocation8 + $0x128] ss:$28 sps:$4 sm:$0xff]  }
 0x125   :  { %1134 = vmatprep.subr.bf16.mxu1 %v1596_v7  ;;  %v1671_v7 = vld [vmem:[#allocation8 + $0x130] ss:$28 sps:$4 sm:$0xff]  }
 0x128   :  { %1135 = vmatpush1.bf16.msra.mxu1 %v1594_v8  ;;  %v1674_v8 = vld [vmem:[#allocation8 + $0xf4] ss:$28 sps:$4 sm:$0xff]  }
 0x129   :  { %1136 = vmatprep.subr.bf16.mxu1 %v1602_v9  ;;  %v1675_v9 = vld [vmem:[#allocation8 + $0x2b8] ss:$28 sps:$4 sm:$0xff]  }
 0x12c   :  { %1137 = vmatpush1.bf16.msra.mxu1 %v1600_v10  ;;  %v1672_v10 = vld [vmem:[#allocation8 + $0xf0] ss:$28 sps:$4 sm:$0xff]  }
 0x12d   :  { %1138 = vmatprep.subr.bf16.mxu1 %v1608_v11  ;;  %v1676_v11 = vld [vmem:[#allocation8 + $0xf8] ss:$28 sps:$4 sm:$0xff]  }
 0x130   :  { %1139 = vmatpush1.bf16.msra.mxu1 %v1606_v12  ;;  %v1679_v12 = vld [vmem:[#allocation8 + $0xbc] ss:$28 sps:$4 sm:$0xff]  }
 0x131   :  { %1140 = vmatprep.subr.bf16.mxu1 %v1614_v13  ;;  %v1680_v13 = vld [vmem:[#allocation8 + $0x280] ss:$28 sps:$4 sm:$0xff]  }
 0x134   :  { %1141 = vmatpush2.bf16.msra.mxu1 %v1612_v14  ;;  %v1677_v14 = vld [vmem:[#allocation8 + $0xb8] ss:$28 sps:$4 sm:$0xff]  }
 0x135   :  { %1142 = vmatprep.subr.bf16.mxu1 %v1620_v15  ;;  %v1681_v15 = vld [vmem:[#allocation8 + $0xc0] ss:$28 sps:$4 sm:$0xff]  }
 0x138   :  { %1143 = vmatpush2.bf16.msra.mxu1 %v1618_v16  ;;  %v1684_v16 = vld [vmem:[#allocation8 + $0x84] ss:$28 sps:$4 sm:$0xff]  }
 0x139   :  { %1144 = vmatprep.subr.bf16.mxu1 %v1626_v17  ;;  %v1685_v17 = vld [vmem:[#allocation8 + $0x248] ss:$28 sps:$4 sm:$0xff]  }
 0x13c   :  { %1145 = vmatpush2.bf16.msra.mxu1 %v1624_v18  ;;  %v1682_v18 = vld [vmem:[#allocation8 + $0x80] ss:$28 sps:$4 sm:$0xff]  }
 0x13d   :  { %1146 = vmatprep.subr.bf16.mxu1 %v1632_v19  ;;  %v1686_v19 = vld [vmem:[#allocation8 + $0x88] ss:$28 sps:$4 sm:$0xff]  }
 0x140   :  { %1147 = vmatpush2.bf16.msra.mxu1 %v1630_v20  ;;  %v1689_v20 = vld [vmem:[#allocation8 + $0x4c] ss:$28 sps:$4 sm:$0xff]  }
 0x141   :  { %1148 = vmatprep.subr.bf16.mxu1 %v1638_v21  ;;  %v1690_v21 = vld [vmem:[#allocation8 + $0x210] ss:$28 sps:$4 sm:$0xff]  }
 0x144   :  { %1149 = vmatpush2.bf16.msra.mxu1 %v1636_v22  ;;  %v1687_v22 = vld [vmem:[#allocation8 + $0x48] ss:$28 sps:$4 sm:$0xff]  }
 0x145   :  { %1150 = vmatprep.subr.bf16.mxu1 %v1644_v24  ;;  %v1694_v24 = vld [vmem:[#allocation8 + $0x14] ss:$28 sps:$4 sm:$0xff]  }
 0x148   :  { %1151 = vmatpush2.bf16.msra.mxu1 %v1642_v26  ;;  %v1692_v26 = vld [vmem:[#allocation8 + $0x10] ss:$28 sps:$4 sm:$0xff]  }
 0x149   :  { %1152 = vmatprep.subr.bf16.mxu1 %v1650_v28  ;;  %v1699_v28 = vld [vmem:[#allocation8 + $0x35c] ss:$28 sps:$4 sm:$0xff]  }
 0x14c   :  { %1153 = vmatpush2.bf16.msra.mxu1 %v1648_v30  ;;  %v1702_v30 = vld [vmem:[#allocation8 + $0x324] ss:$28 sps:$4 sm:$0xff]  }
 0x14d   :  { %1154 = vmatprep.subr.bf16.mxu1 %v1656_v32  ;;  %v1705_v32 = vld [vmem:[#allocation8 + $0x2ec] ss:$28 sps:$4 sm:$0xff]  }
 0x150   :  { %1155 = vmatpush2.bf16.msra.mxu1 %v1654_v34  ;;  %v1708_v34 = vld [vmem:[#allocation8 + $0x2b4] ss:$28 sps:$4 sm:$0xff]  }
 0x151   :  { %1484 = vmatprep.subr.bf16.mxu1 %v1660_v36  ;;  %v1711_v36 = vld [vmem:[#allocation8 + $0x27c] ss:$28 sps:$4 sm:$0xff]  }
 0x1d3   :  { %v321_v44 = vpop.f32.mrf.mxu1 }
 0x1d4   :  { %v322_v47 = vadd.f32 %v321_v44, %v200_v43  ;;  %v1715_v44 = vld [vmem:[#allocation8 + $0x208] ss:$28 sps:$4 sm:$0xff]  }
 0x1d5   :  { %v323_v45 = vpop.f32.mrf.mxu1 }
 0x1d6   :  { %v324_v46 = vadd.f32 %v323_v45, %v204_v42  ;;  %v330_v54 = vmul.f32 0.01, %v322_v47  ;;  %v1720_v45 = vld [vmem:[#allocation8 + $0x1d4] ss:$28 sps:$4 sm:$0xff]  }
 0x1d7   :  { %v325_v48 = vpop.f32.mrf.mxu1 }
 0x1d8   :  { %v326_v49 = vadd.f32 %v325_v48, %v200_v43  ;;  %v331_v51 = vmul.f32 0.01, %v324_v46  ;;  %v334_v59 = vmax.f32 %v322_v47, %v330_v54  ;;  %v1717_v43 = vld [vmem:[#allocation8 + $0x20c] ss:$28 sps:$4 sm:$0xff]   ;;  %v480_v47 = vsub.s32 2, %v1901_v38  ;;  %v468_v48 = vld [vmem:[%s1942_s6] sm:$0xff] }
 0x1d9   :  { %v327_v50 = vpop.f32.mrf.mxu1  ;;  %s1842_s6 = smov [#allocation10]  }
 0x1da   :  { %v332_v52 = vmul.f32 0.01, %v326_v49  ;;  %v328_v53 = vadd.f32 %v327_v50, %v204_v42  ;;  %v335_v57 = vmax.f32 %v324_v46, %v331_v51  ;;  %v1712_v42 = vld [vmem:[#allocation8 + $0x240] ss:$28 sps:$4 sm:$0xff]   ;;  %v1718_v46 = vld [vmem:[#allocation8 + $0x1d0] ss:$28 sps:$4 sm:$0xff]   ;;  %v481_v50 = vrot.slane %v468_v48, %v480_v47 }
 0x1db   :  { %v477_v51 = vrot.slane %v468_v48, %v203_v39  ;;  %s1314_s27 = sshll.u32 %s1842_s6, 4  ;;  %s1315_s27 = int_to_ptr.vmem [resolvable:$true] %s1314_s27 }
 0x1dc   :  { %v333_v55 = vmul.f32 0.01, %v328_v53  ;;  %v336_v56 = vmax.f32 %v326_v49, %v332_v52  ;;  %v473_v49 = vrot.slane %v468_v48, %v199_v40  ;;  %s1801_s28 = scalar_lea.vmem %s1315_s27, 896  ;;  %p1806_p7 = scmp.lt.s32.totalorder %s1315_s27, %s1315_s27 }
 0x1dd   :  { %p1802_p6 = scmp.ne.s32.totalorder %s1315_s27, %s1801_s28  ;;  %p1807_p8 = scmp.lt.s32.totalorder %s1801_s28, %s1801_s28 }
 0x1de   :  { %v337_v58 = vmax.f32 %v328_v53, %v333_v55  ;;  %v1912_v63 = vpack.c.bf16 %v336_v56, %v334_v59 }
 0x1df   :  { %p1808_p9 = por %p1807_p8, %p1806_p7 }
 0x1e0   :  { %v339_v60 = vpack.c.bf16 %v337_v58, %v335_v57 }
 0x1e1   :  { %p1809_p10 = pnand %p1808_p9, %p1802_p6 }
 0x1e2   :  { %1113 = vmatprep.mubr.bf16.mxu0 %v339_v60  ;;  %1156 = vmatprep.mubr.bf16.mxu1 %v339_v60 }
 0x1e3   :  { %1114 = vmatmul.mubr.bf16.vlgmr.msra.gmra.mxu0 %v1912_v63  ;;  %1157 = vmatmul.mubr.bf16.vlgmr.msra.gmra.mxu1 %v1912_v63 }
 0x1e4   :  { %1168 = vmatpush1.bf16.msra.mxu0 %v1657_v61  ;;  %1485 = vmatpush3.bf16.msra.mxu1 %v1661_v62 }
 0x1e5   :  { %1199 = vmatprep.mubr.bf16.mxu0 %v339_v60  ;;  %1242 = vmatprep.mubr.bf16.mxu1 %v339_v60 }
 0x1e6   :  { %1169 = vmatprep.subr.bf16.mxu0 %v1664_v0  ;;  %1486 = vmatprep.subr.bf16.mxu1 %v1665_v1 }
 0x1e8   :  { %1170 = vmatpush1.bf16.msra.mxu0 %v1662_v2  ;;  %1487 = vmatpush3.bf16.msra.mxu1 %v1666_v3 }
 0x1e9   :  { %1171 = vmatprep.subr.bf16.mxu0 %v1669_v4  ;;  %1488 = vmatprep.subr.bf16.mxu1 %v1670_v5 }
 0x1ec   :  { %1172 = vmatpush1.bf16.msra.mxu0 %v1667_v6  ;;  %1489 = vmatpush3.bf16.msra.mxu1 %v1671_v7 }
 0x1ed   :  { %1173 = vmatprep.subr.bf16.mxu0 %v1674_v8  ;;  %1490 = vmatprep.subr.bf16.mxu1 %v1675_v9 }
 0x1f0   :  { %1174 = vmatpush1.bf16.msra.mxu0 %v1672_v10  ;;  %1491 = vmatpush3.bf16.msra.mxu1 %v1676_v11 }
 0x1f1   :  { %1175 = vmatprep.subr.bf16.mxu0 %v1679_v12  ;;  %1492 = vmatprep.subr.bf16.mxu1 %v1680_v13  ;;  %v484_v12 = vsub.s32 3, %v1901_v38  ;;  %v488_v13 = vsub.s32 4, %v1901_v38 }
 0x1f4   :  { %1176 = vmatpush1.bf16.msra.mxu0 %v1677_v14  ;;  %1493 = vmatpush3.bf16.msra.mxu1 %v1681_v15  ;;  %v496_v14 = vsub.s32 6, %v1901_v38  ;;  %v492_v15 = vsub.s32 5, %v1901_v38 }
 0x1f5   :  { %1177 = vmatprep.subr.bf16.mxu0 %v1684_v16  ;;  %1494 = vmatprep.subr.bf16.mxu1 %v1685_v17  ;;  %v485_v17 = vrot.slane %v468_v48, %v484_v12 }
 0x1f8   :  { %1178 = vmatpush1.bf16.msra.mxu0 %v1682_v18  ;;  %1495 = vmatpush3.bf16.msra.mxu1 %v1686_v19  ;;  %v489_v18 = vrot.slane %v468_v48, %v488_v13  ;;  %v497_v19 = vrot.slane %v468_v48, %v496_v14 }
 0x1f9   :  { %1179 = vmatprep.subr.bf16.mxu0 %v1689_v20  ;;  %1496 = vmatprep.subr.bf16.mxu1 %v1690_v21  ;;  %v493_v21 = vrot.slane %v468_v48, %v492_v15 }
 0x1fc   :  { %1180 = vmatpush1.bf16.msra.mxu0 %v1687_v22  ;;  %1497 = vmatpush3.bf16.msra.mxu1 %v1691_v23 }
 0x1fd   :  { %1181 = vmatprep.subr.bf16.mxu0 %v1694_v24  ;;  %1498 = vmatprep.subr.bf16.mxu1 %v1695_v25 }
 0x200   :  { %1182 = vmatpush1.bf16.msra.mxu0 %v1692_v26  ;;  %1499 = vmatpush3.bf16.msra.mxu1 %v1696_v27 }
 0x201   :  { %1183 = vmatprep.subr.bf16.mxu0 %v1699_v28 }
 0x203   :  { %1243 = vmatmul.mubr.bf16.vlgmr.msra.gmra.mxu1 %v1912_v63 }
 0x204   :  { %1184 = vmatpush2.bf16.msra.mxu0 %v1697_v29 }
 0x205   :  { %1185 = vmatprep.subr.bf16.mxu0 %v1702_v30 }
 0x208   :  { %1186 = vmatpush2.bf16.msra.mxu0 %v1700_v31 }
 0x209   :  { %1187 = vmatprep.subr.bf16.mxu0 %v1705_v32 }
 0x20c   :  { %1188 = vmatpush2.bf16.msra.mxu0 %v1703_v33 }
 0x20d   :  { %1189 = vmatprep.subr.bf16.mxu0 %v1708_v34 }
 0x210   :  { %1190 = vmatpush2.bf16.msra.mxu0 %v1706_v35 }
 0x211   :  { %1191 = vmatprep.subr.bf16.mxu0 %v1711_v36 }
 0x214   :  { %1192 = vmatpush2.bf16.msra.mxu0 %v1709_v37 }
 0x215   :  { %1193 = vmatprep.subr.bf16.mxu0 %v1714_v41 }
 0x218   :  { %1194 = vmatpush2.bf16.msra.mxu0 %v1712_v42 }
 0x219   :  { %1195 = vmatprep.subr.bf16.mxu0 %v1717_v43 }
 0x21c   :  { %1196 = vmatpush2.bf16.msra.mxu0 %v1715_v44 }
 0x21d   :  { %1197 = vmatprep.subr.bf16.mxu0 %v1720_v45 }
 0x220   :  { %1198 = vmatpush2.bf16.msra.mxu0 %v1718_v46 }
 0x223   :  { %1200 = vmatmul.mubr.bf16.vlgmr.msra.gmra.mxu0 %v1912_v63 }
 0x2a3   :  { %v1115_v52 = vpop.f32.mrf.mxu0  ;;  %v1158_v53 = vpop.f32.mrf.mxu1 }
 0x2a4   :  { %v1116_v54 = vadd.f32 %v1115_v52, %v473_v49  ;;  %v1159_v55 = vadd.f32 %v1158_v53, %v481_v50 }
 0x2a5   :  { %v1117_v56 = vpop.f32.mrf.mxu0  ;;  %v1160_v57 = vpop.f32.mrf.mxu1 }
 0x2a6   :  { %v1253_v58 = vand.u32 2147483647, %v1159_v55  ;;  %v1118_v59 = vadd.f32 %v1117_v56, %v477_v51  ;;  %v1251_v60 = vand.u32 2147483647, %v1116_v54  ;;  %v1161_v24 = vadd.f32 %v1160_v57, %v485_v17 }
 0x2a7   :  { %v1119_v61 = vpop.f32.mrf.mxu0  ;;  %v1162_v62 = vpop.f32.mrf.mxu1 }
 0x2a8   :  { %v1472_v63 = vpack.c.bf16 %v1253_v58, %v1253_v58  ;;  %v1252_v0 = vand.u32 2147483647, %v1118_v59  ;;  %v1120_v1 = vadd.f32 %v1119_v61, %v473_v49  ;;  %v1163_v2 = vadd.f32 %v1162_v62, %v481_v50 }
 0x2a9   :  { %v1121_v40 = vpop.f32.mrf.mxu0  ;;  %v1164_v9 = vpop.f32.mrf.mxu1 }
 0x2aa   :  { %1278 = vst [vmem:[#allocation10 + $0x8] sm:$0xf] %v1472_v63  ;;  %v1471_v3 = vpack.c.bf16 %v1252_v0, %v1251_v60  ;;  %v1256_v4 = vand.u32 2147483647, %v1163_v2  ;;  %v1122_v39 = vadd.f32 %v1121_v40, %v477_v51  ;;  %v1254_v5 = vand.u32 2147483647, %v1120_v1 }
 0x2ab   :  { %v1165_v32 = vadd.f32 %v1164_v9, %v485_v17 }
 0x2ac   :  { %1277 = vst [vmem:[#allocation10] sm:$0xff] %v1471_v3  ;;  %v1474_v6 = vpack.c.bf16 %v1256_v4, %v1256_v4  ;;  %v1255_v7 = vand.u32 2147483647, %v1122_v39 }
 0x2ae   :  { %1280 = vst [vmem:[#allocation10 + $0x24] sm:$0xf] %v1474_v6  ;;  %v1473_v8 = vpack.c.bf16 %v1255_v7, %v1254_v5 }
 0x2b0   :  { %1279 = vst [vmem:[#allocation10 + $0x1c] sm:$0xff] %v1473_v8 }
 0x2c3   :  { %v1500_v10 = vpop.f32.mrf.mxu1 }
 0x2c5   :  { %v1501_v11 = vpop.f32.mrf.mxu1 }
 0x2c6   :  { %v1502_v20 = vadd.f32 %v1501_v11, %v1500_v10 }
 0x2c7   :  { %v1503_v16 = vpop.f32.mrf.mxu1 }
 0x2c8   :  { %v1245_v27 = vadd.f32 %v1502_v20, %v497_v19 }
 0x2c9   :  { %v1504_v22 = vpop.f32.mrf.mxu1 }
 0x2ca   :  { %v1505_v28 = vadd.f32 %v1504_v22, %v1503_v16 }
 0x2cc   :  { %v1248_v35 = vadd.f32 %v1505_v28, %v497_v19 }
 0x2e3   :  { %v1201_v23 = vpop.f32.mrf.mxu0 }
 0x2e4   :  { %v1202_v25 = vadd.f32 %v1201_v23, %v489_v18 }
 0x2e5   :  { %v1203_v26 = vpop.f32.mrf.mxu0 }
 0x2e6   :  { %v1475_v29 = vpack.c.bf16 %v1202_v25, %v1161_v24  ;;  %v1204_v30 = vadd.f32 %v1203_v26, %v493_v21 }
 0x2e7   :  { %v1205_v31 = vpop.f32.mrf.mxu0 }
 0x2e8   :  { %1305 = vst [vmem:[#allocation10 + $0xc] sm:$0xff] %v1475_v29  ;;  %v1476_v33 = vpack.c.bf16 %v1245_v27, %v1204_v30  ;;  %v1206_v38 = vadd.f32 %v1205_v31, %v489_v18 }
 0x2e9   :  { %v1207_v34 = vpop.f32.mrf.mxu0 }
 0x2ea   :  { %1306 = vst [vmem:[#allocation10 + $0x14] sm:$0xff] %v1476_v33  ;;  %v1477_v36 = vpack.c.bf16 %v1206_v38, %v1165_v32  ;;  %v1208_v37 = vadd.f32 %v1207_v34, %v493_v21 }
 0x2ec   :  { %1307 = vst [vmem:[#allocation10 + $0x28] sm:$0xff] %v1477_v36  ;;  %v1478_v41 = vpack.c.bf16 %v1248_v35, %v1208_v37 }
 0x2ee   :  { %1308 = vst [vmem:[#allocation10 + $0x30] sm:$0xff] %v1478_v41 }
 0x2ef   :  { %1812 = shalt.err (!%p1809_p10)
}
 0x2f0   :  { %1320 = dma.vmem_to_hbm [thread:$0]  %s1315_s27, 896, %s1943_s7, [#allocation4], %s1837_s21, %s1837_s21, %s1838_s22  }
 0x2f1   :  { %1827 = dma.done.wait [#allocation4], 896  }
 0x2f2   :  { %1828 = vsyncadd [#allocation4], 4294966400 }
 0x2f3   :  { %1324 = vsyncpa [#allocation3], 1 }
 0x2f4   :  { %1325 = vsyncpa [#allocation6], 1 }
 0x2f5   :  { %1326 = vsyncpa [#allocation9], 1 }
 0x2f6   :  { %1327 = vsyncpa [#allocation4], 1 }

// kernel: tpu_custom_call.1
= control target key start
LH: loop header
LB: loop body
LE: loop exit
PB: predicated region body
PF: predicated region fallthrough
CT: control target
= control target key end

     0   :  { %12 = vsyncpa [#allocation3], 0  ;;  %s1936_s0 = inlined_call_operand.hbm [shape: bf16[16,64], index: 0, kind: input, shape index: {}]   ;;  %s1937_s1 = inlined_call_operand.hbm [shape: bf16[64,128], index: 1, kind: input, shape index: {}]   ;;  %s1938_s2 = inlined_call_operand.vmem [shape: f32[1,128], index: 2, kind: input, shape index: {}]   ;;  %s1939_s3 = inlined_call_operand.hbm [shape: bf16[128,256], index: 3, kind: input, shape index: {}]   ;;  %s1940_s4 = inlined_call_operand.vmem [shape: f32[1,256], index: 4, kind: input, shape index: {}]   ;;  %s1941_s5 = inlined_call_operand.hbm [shape: bf16[256,896], index: 5, kind: input, shape index: {}]   ;;  %s1942_s6 = inlined_call_operand.vmem [shape: f32[1,896], index: 6, kind: input, shape index: {}]   ;;  %s1943_s7 = inlined_call_operand.hbm [shape: bf16[16,896], index: 7, kind: output, shape index: {}]  }
   0x1   :  { %13 = vsyncpa [#allocation6], 0 }
   0x2   :  { %14 = vsyncpa [#allocation9], 0 }
   0x3   :  { %15 = vsyncpa [#allocation4], 0  ;;  %s1829_s24 = smov [#allocation5]   ;;  %s1830_s26 = smov [#allocation2]  }
   0x4   :  { %s33_s25 = sshll.u32 %s1829_s24, 4  ;;  %s21_s27 = sshll.u32 %s1830_s26, 4  ;;  %s34_s25 = int_to_ptr.vmem [resolvable:$true] %s33_s25  ;;  %s22_s27 = int_to_ptr.vmem [resolvable:$true] %s21_s27 }
   0x5   :  { %s1729_s28 = scalar_lea.vmem %s34_s25, 512  ;;  %p1734_p1 = scmp.lt.s32.totalorder %s34_s25, %s34_s25 }
   0x6   :  { %p1730_p0 = scmp.ne.s32.totalorder %s34_s25, %s1729_s28  ;;  %p1735_p2 = scmp.lt.s32.totalorder %s1729_s28, %s1729_s28 }
   0x8   :  { %p1736_p3 = por %p1735_p2, %p1734_p1 }
   0xa   :  { %p1737_p4 = pnand %p1736_p3, %p1730_p0 }
   0xc   :  { %1740 = shalt.err (!%p1737_p4)
}
   0xd   :  { %s1831_s29 = smov 64   ;;  %s1832_s30 = smov 4  }
   0xe   :  { %39 = dma.hbm_to_vmem [thread:$0]  %s1937_s1, 512, %s34_s25, [#allocation6], %s1831_s29, %s1831_s29, %s1832_s30  }
   0xf   :  { %s1749_s10 = scalar_lea.vmem %s22_s27, 128  ;;  %p1754_p6 = scmp.lt.s32.totalorder %s22_s27, %s22_s27 }
  0x10   :  { %p1750_p5 = scmp.ne.s32.totalorder %s22_s27, %s1749_s10  ;;  %p1755_p7 = scmp.lt.s32.totalorder %s1749_s10, %s1749_s10 }
  0x12   :  { %p1756_p8 = por %p1755_p7, %p1754_p6 }
  0x14   :  { %p1757_p9 = pnand %p1756_p8, %p1750_p5 }
  0x16   :  { %1760 = shalt.err (!%p1757_p9)
}
  0x17   :  { %27 = dma.hbm_to_vmem [thread:$0]  %s1936_s0, 128, %s22_s27, [#allocation3], %s1831_s29, %s1831_s29, %s1832_s30  }
  0x18   :  { %s1833_s13 = smov [#allocation7]  }
  0x19   :  { %s47_s14 = sshll.u32 %s1833_s13, 4  ;;  %s48_s14 = int_to_ptr.vmem [resolvable:$true] %s47_s14 }
  0x1a   :  { %s1769_s15 = scalar_lea.vmem %s48_s14, 2048  ;;  %p1774_p11 = scmp.lt.s32.totalorder %s48_s14, %s48_s14 }
  0x1b   :  { %p1770_p10 = scmp.ne.s32.totalorder %s48_s14, %s1769_s15  ;;  %p1775_p12 = scmp.lt.s32.totalorder %s1769_s15, %s1769_s15 }
  0x1d   :  { %p1776_p13 = por %p1775_p12, %p1774_p11 }
  0x1f   :  { %p1777_p0 = pnand %p1776_p13, %p1770_p10 }
  0x21   :  { %1780 = shalt.err (!%p1777_p0)
}
  0x22   :  { %s1834_s1 = smov 128   ;;  %s1835_s16 = smov 8  }
  0x23   :  { %53 = dma.hbm_to_vmem [thread:$0]  %s1939_s3, 2048, %s48_s14, [#allocation6], %s1834_s1, %s1834_s1, %s1835_s16  }
  0x24   :  { %s1836_s19 = smov [#allocation8]  }
  0x25   :  { %s61_s20 = sshll.u32 %s1836_s19, 4  ;;  %s62_s20 = int_to_ptr.vmem [resolvable:$true] %s61_s20 }
  0x26   :  { %s1789_s0 = scalar_lea.vmem %s62_s20, 14336  ;;  %p1794_p2 = scmp.lt.s32.totalorder %s62_s20, %s62_s20 }
  0x27   :  { %p1790_p1 = scmp.ne.s32.totalorder %s62_s20, %s1789_s0  ;;  %p1795_p3 = scmp.lt.s32.totalorder %s1789_s0, %s1789_s0 }
  0x29   :  { %p1796_p4 = por %p1795_p3, %p1794_p2 }
  0x2b   :  { %p1797_p5 = pnand %p1796_p4, %p1790_p1 }
  0x2d   :  { %1800 = shalt.err (!%p1797_p5)
}
  0x2e   :  { %s1837_s21 = smov 448   ;;  %s1838_s22 = smov 28  }
  0x2f   :  { %67 = dma.hbm_to_vmem [thread:$0]  %s1941_s5, 14336, %s62_s20, [#allocation9], %s1837_s21, %s1837_s21, %s1838_s22  }
  0x30   :  { %1821 = dma.done.wait [#allocation3], 128  }
  0x31   :  { %1822 = vsyncadd [#allocation3], 4294967168 }
  0x32   :  { %1823 = dma.done.wait [#allocation6], 2560  }
  0x33   :  { %1824 = vsyncadd [#allocation6], 4294964736 }
  0x34   :  { %1825 = dma.done.wait [#allocation9], 14336  }
  0x35   :  { %1826 = vsyncadd [#allocation9], 4294952960  ;;  %v1839_v0 = vmov 0.0   ;;  %vm1840_vm0 = vmmov 0   ;;  %v1532_v1 = vld [vmem:[#allocation5 + $0x18] sm:$0xff]   ;;  %v1533_v2 = vld [vmem:[#allocation5 + $0x10] sm:$0xff]  }
  0x36   :  { %1506 = vmatprep.subr.bf16.mxu0 %v1839_v0  ;;  %1514 = vmatprep.mubr.msk.bf16.mxu0 %vm1840_vm0, %v1839_v0  ;;  %v1534_v3 = vld [vmem:[#allocation5 + $0x8] sm:$0xff]   ;;  %v1537_v4 = vld [vmem:[#allocation7 + $0x74] ss:$8 sps:$4 sm:$0xff]   ;;  %v1539_v5 = vld [vmem:[#allocation7 + $0x70] ss:$8 sps:$4 sm:$0xff]   ;;  %vm129_vm1 = vcmask 523264  }
  0x37   :  { %1507 = vmatpush3.bf16.msra.mxu0 %v1532_v1  ;;  %287 = vmatprep.subr.bf16.mxu1 %v1537_v4  ;;  %v1540_v6 = vld [vmem:[#allocation7 + $0x64] ss:$8 sps:$4 sm:$0xff]   ;;  %v1542_v7 = vld [vmem:[#allocation7 + $0x60] ss:$8 sps:$4 sm:$0xff]   ;;  %v1543_v8 = vld [vmem:[#allocation7 + $0x54] ss:$8 sps:$4 sm:$0xff]  }
  0x38   :  { %1508 = vmatprep.subr.bf16.mxu0 %v1839_v0  ;;  %288 = vmatpush1.bf16.msra.mxu1 %v1539_v5  ;;  %v1535_v9 = vld [vmem:[#allocation5] sm:$0xff]   ;;  %v1536_v10 = vld [vmem:[#allocation2] sm:$0xff]   ;;  %v1841_v22 = vmov 0   ;;  %v1563_v24 = vld [vmem:[#allocation8 + $0x18c] ss:$28 sps:$4 sm:$0xff]  }
  0x39   :  { %289 = vmatprep.subr.bf16.mxu1 %v1540_v6  ;;  %v1545_v11 = vld [vmem:[#allocation7 + $0x50] ss:$8 sps:$4 sm:$0xff]   ;;  %v1546_v12 = vld [vmem:[#allocation7 + $0x44] ss:$8 sps:$4 sm:$0xff]   ;;  %v1548_v13 = vld [vmem:[#allocation7 + $0x40] ss:$8 sps:$4 sm:$0xff]   ;;  %319 = vmatprep.mubr.bf16.mxu1 %v1841_v22 }
  0x3a   :  { %v1549_v14 = vld [vmem:[#allocation7 + $0x34] ss:$8 sps:$4 sm:$0xff]   ;;  %v1551_v15 = vld [vmem:[#allocation7 + $0x30] ss:$8 sps:$4 sm:$0xff]   ;;  %v1552_v16 = vld [vmem:[#allocation7 + $0x24] ss:$8 sps:$4 sm:$0xff]  }
  0x3b   :  { %1509 = vmatpush3.bf16.msra.mxu0 %v1533_v2  ;;  %v1554_v17 = vld [vmem:[#allocation7 + $0x20] ss:$8 sps:$4 sm:$0xff]   ;;  %v1555_v18 = vld [vmem:[#allocation7 + $0x14] ss:$8 sps:$4 sm:$0xff]   ;;  %v1557_v19 = vld [vmem:[#allocation7 + $0x10] ss:$8 sps:$4 sm:$0xff]  }
  0x3c   :  { %1510 = vmatprep.subr.bf16.mxu0 %v1839_v0  ;;  %290 = vmatpush1.bf16.msra.mxu1 %v1542_v7  ;;  %v1558_v20 = vld [vmem:[#allocation7 + $0x4] ss:$8 sps:$4 sm:$0xff]   ;;  %v1560_v21 = vld [vmem:[#allocation7] ss:$8 sps:$4 sm:$0xff]   ;;  %v1566_v25 = vld [vmem:[#allocation8 + $0x194] ss:$28 sps:$4 sm:$0xff]  }
  0x3d   :  { %291 = vmatprep.subr.bf16.mxu1 %v1543_v8  ;;  %v1561_v23 = vld [vmem:[#allocation8 + $0x188] ss:$28 sps:$4 sm:$0xff]   ;;  %v1569_v26 = vld [vmem:[#allocation8 + $0x154] ss:$28 sps:$4 sm:$0xff]   ;;  %v1575_v28 = vld [vmem:[#allocation8 + $0x11c] ss:$28 sps:$4 sm:$0xff]  }
  0x3e   :  { %v1567_v27 = vld [vmem:[#allocation8 + $0x150] ss:$28 sps:$4 sm:$0xff]   ;;  %v1573_v29 = vld [vmem:[#allocation8 + $0x118] ss:$28 sps:$4 sm:$0xff]   ;;  %v1581_v30 = vld [vmem:[#allocation8 + $0xe4] ss:$28 sps:$4 sm:$0xff]  }
  0x3f   :  { %1511 = vmatpush3.bf16.msra.mxu0 %v1534_v3  ;;  %v1579_v31 = vld [vmem:[#allocation8 + $0xe0] ss:$28 sps:$4 sm:$0xff]   ;;  %v1587_v32 = vld [vmem:[#allocation8 + $0xac] ss:$28 sps:$4 sm:$0xff]   ;;  %v1593_v34 = vld [vmem:[#allocation8 + $0x74] ss:$28 sps:$4 sm:$0xff]  }
  0x40   :  { %1512 = vmatprep.subr.bf16.mxu0 %v1839_v0  ;;  %292 = vmatpush1.bf16.msra.mxu1 %v1545_v11  ;;  %v1585_v33 = vld [vmem:[#allocation8 + $0xa8] ss:$28 sps:$4 sm:$0xff]   ;;  %v1591_v35 = vld [vmem:[#allocation8 + $0x70] ss:$28 sps:$4 sm:$0xff]   ;;  %v1599_v36 = vld [vmem:[#allocation8 + $0x3c] ss:$28 sps:$4 sm:$0xff]  }
  0x41   :  { %293 = vmatprep.subr.bf16.mxu1 %v1546_v12  ;;  %v1597_v37 = vld [vmem:[#allocation8 + $0x38] ss:$28 sps:$4 sm:$0xff]   ;;  %v1605_v38 = vld [vmem:[#allocation8 + $0x4] ss:$28 sps:$4 sm:$0xff]   ;;  %v1611_v40 = vld [vmem:[#allocation8 + $0x34c] ss:$28 sps:$4 sm:$0xff]  }
  0x42   :  { %v1603_v39 = vld [vmem:[#allocation8] ss:$28 sps:$4 sm:$0xff]   ;;  %v1609_v41 = vld [vmem:[#allocation8 + $0x348] ss:$28 sps:$4 sm:$0xff]   ;;  %v1617_v42 = vld [vmem:[#allocation8 + $0x314] ss:$28 sps:$4 sm:$0xff]  }
  0x43   :  { %1513 = vmatpush3.bf16.msra.mxu0 %v1535_v9  ;;  %v1615_v43 = vld [vmem:[#allocation8 + $0x310] ss:$28 sps:$4 sm:$0xff]   ;;  %v1623_v44 = vld [vmem:[#allocation8 + $0x2dc] ss:$28 sps:$4 sm:$0xff]   ;;  %v1629_v46 = vld [vmem:[#allocation8 + $0x2a4] ss:$28 sps:$4 sm:$0xff]  }
  0x44   :  { %294 = vmatpush1.bf16.msra.mxu1 %v1548_v13  ;;  %1081 = vmatprep.subr.bf16.mxu0 %v1563_v24  ;;  %v1621_v45 = vld [vmem:[#allocation8 + $0x2d8] ss:$28 sps:$4 sm:$0xff]   ;;  %v1627_v47 = vld [vmem:[#allocation8 + $0x2a0] ss:$28 sps:$4 sm:$0xff]   ;;  %v1635_v48 = vld [vmem:[#allocation8 + $0x26c] ss:$28 sps:$4 sm:$0xff]  }
  0x45   :  { %295 = vmatprep.subr.bf16.mxu1 %v1549_v14  ;;  %v1633_v49 = vld [vmem:[#allocation8 + $0x268] ss:$28 sps:$4 sm:$0xff]   ;;  %v1328_v50 = vld [vmem:[%s1938_s2] ss:$0 sm:$0xff]  ;;  %v1564_v61 = vld [vmem:[#allocation8 + $0x190] ss:$28 sps:$4 sm:$0xff]  }
  0x46   :  { %1515 = vmatmul.mubr.msk.bf16.vlgmr.msra.gmra.mxu0 %vm129_vm1, %v1536_v10  ;;  %v1572_v63 = vld [vmem:[#allocation8 + $0x15c] ss:$28 sps:$4 sm:$0xff]   ;;  %v1578_v1 = vld [vmem:[#allocation8 + $0x124] ss:$28 sps:$4 sm:$0xff]   ;;  %v1584_v3 = vld [vmem:[#allocation8 + $0xec] ss:$28 sps:$4 sm:$0xff]  }
  0x47   :  { %1082 = vmatpush1.bf16.msra.mxu0 %v1561_v23  ;;  %v1570_v0 = vld [vmem:[#allocation8 + $0x158] ss:$28 sps:$4 sm:$0xff]   ;;  %v1576_v2 = vld [vmem:[#allocation8 + $0x120] ss:$28 sps:$4 sm:$0xff]   ;;  %v1582_v4 = vld [vmem:[#allocation8 + $0xe8] ss:$28 sps:$4 sm:$0xff]  }
  0x48   :  { %296 = vmatpush1.bf16.msra.mxu1 %v1551_v15  ;;  %1083 = vmatprep.subr.bf16.mxu0 %v1569_v26  ;;  %v1590_v5 = vld [vmem:[#allocation8 + $0xb4] ss:$28 sps:$4 sm:$0xff]   ;;  %v1596_v7 = vld [vmem:[#allocation8 + $0x7c] ss:$28 sps:$4 sm:$0xff]   ;;  %v1602_v9 = vld [vmem:[#allocation8 + $0x44] ss:$28 sps:$4 sm:$0xff]  }
  0x49   :  { %297 = vmatprep.subr.bf16.mxu1 %v1552_v16  ;;  %v1588_v6 = vld [vmem:[#allocation8 + $0xb0] ss:$28 sps:$4 sm:$0xff]   ;;  %v1594_v8 = vld [vmem:[#allocation8 + $0x78] ss:$28 sps:$4 sm:$0xff]   ;;  %v1600_v10 = vld [vmem:[#allocation8 + $0x40] ss:$28 sps:$4 sm:$0xff]  }
  0x4a   :  { %v1608_v11 = vld [vmem:[#allocation8 + $0xc] ss:$28 sps:$4 sm:$0xff]   ;;  %v1614_v13 = vld [vmem:[#allocation8 + $0x354] ss:$28 sps:$4 sm:$0xff]   ;;  %v1620_v15 = vld [vmem:[#allocation8 + $0x31c] ss:$28 sps:$4 sm:$0xff]  }
  0x4b   :  { %1084 = vmatpush1.bf16.msra.mxu0 %v1567_v27  ;;  %v1606_v12 = vld [vmem:[#allocation8 + $0x8] ss:$28 sps:$4 sm:$0xff]   ;;  %v1612_v14 = vld [vmem:[#allocation8 + $0x350] ss:$28 sps:$4 sm:$0xff]   ;;  %v1618_v16 = vld [vmem:[#allocation8 + $0x318] ss:$28 sps:$4 sm:$0xff]  }
  0x4c   :  { %298 = vmatpush1.bf16.msra.mxu1 %v1554_v17  ;;  %1085 = vmatprep.subr.bf16.mxu0 %v1575_v28  ;;  %v1626_v17 = vld [vmem:[#allocation8 + $0x2e4] ss:$28 sps:$4 sm:$0xff]   ;;  %v1636_v22 = vld [vmem:[#allocation8 + $0x270] ss:$28 sps:$4 sm:$0xff]   ;;  %v1644_v24 = vld [vmem:[#allocation8 + $0x23c] ss:$28 sps:$4 sm:$0xff]  }
  0x4d   :  { %299 = vmatprep.subr.bf16.mxu1 %v1555_v18  ;;  %v1624_v18 = vld [vmem:[#allocation8 + $0x2e0] ss:$28 sps:$4 sm:$0xff]   ;;  %v1641_v23 = vld [vmem:[#allocation8 + $0x234] ss:$28 sps:$4 sm:$0xff]  }
  0x4e   :  { %v1642_v26 = vld [vmem:[#allocation8 + $0x238] ss:$28 sps:$4 sm:$0xff]   ;;  %v1650_v28 = vld [vmem:[#allocation8 + $0x204] ss:$28 sps:$4 sm:$0xff]  }
  0x4f   :  { %1086 = vmatpush1.bf16.msra.mxu0 %v1573_v29  ;;  %v1647_v27 = vld [vmem:[#allocation8 + $0x1fc] ss:$28 sps:$4 sm:$0xff]  }
  0x50   :  { %300 = vmatpush1.bf16.msra.mxu1 %v1557_v19  ;;  %1087 = vmatprep.subr.bf16.mxu0 %v1581_v30  ;;  %v1632_v19 = vld [vmem:[#allocation8 + $0x2ac] ss:$28 sps:$4 sm:$0xff]   ;;  %v1645_v29 = vld [vmem:[#allocation8 + $0x1f8] ss:$28 sps:$4 sm:$0xff]   ;;  %v1648_v30 = vld [vmem:[#allocation8 + $0x200] ss:$28 sps:$4 sm:$0xff]  }
  0x51   :  { %301 = vmatprep.subr.bf16.mxu1 %v1558_v20  ;;  %v1630_v20 = vld [vmem:[#allocation8 + $0x2a8] ss:$28 sps:$4 sm:$0xff]  }
  0x53   :  { %1088 = vmatpush1.bf16.msra.mxu0 %v1579_v31  ;;  %v1653_v31 = vld [vmem:[#allocation8 + $0x1c4] ss:$28 sps:$4 sm:$0xff]  }
  0x54   :  { %302 = vmatpush1.bf16.msra.mxu1 %v1560_v21  ;;  %1089 = vmatprep.subr.bf16.mxu0 %v1587_v32  ;;  %v1638_v21 = vld [vmem:[#allocation8 + $0x274] ss:$28 sps:$4 sm:$0xff]   ;;  %v1656_v32 = vld [vmem:[#allocation8 + $0x1cc] ss:$28 sps:$4 sm:$0xff]  }
  0x55   :  { %1124 = vmatprep.subr.bf16.mxu1 %v1566_v25  ;;  %v1639_v25 = vld [vmem:[#allocation8 + $0x230] ss:$28 sps:$4 sm:$0xff]  }
  0x57   :  { %1090 = vmatpush1.bf16.msra.mxu0 %v1585_v33  ;;  %v1651_v33 = vld [vmem:[#allocation8 + $0x1c0] ss:$28 sps:$4 sm:$0xff]  }
  0x58   :  { %1091 = vmatprep.subr.bf16.mxu0 %v1593_v34  ;;  %v1654_v34 = vld [vmem:[#allocation8 + $0x1c8] ss:$28 sps:$4 sm:$0xff]  }
  0x5b   :  { %1092 = vmatpush1.bf16.msra.mxu0 %v1591_v35  ;;  %v1659_v35 = vld [vmem:[#allocation8 + $0x19c] ss:$28 sps:$4 sm:$0xff]  }
  0x5c   :  { %1093 = vmatprep.subr.bf16.mxu0 %v1599_v36  ;;  %v1660_v36 = vld [vmem:[#allocation8 + $0x360] ss:$28 sps:$4 sm:$0xff]  }
  0x5f   :  { %1094 = vmatpush1.bf16.msra.mxu0 %v1597_v37  ;;  %v197_v37 = vlaneseq }
  0x60   :  { %1095 = vmatprep.subr.bf16.mxu0 %v1605_v38 }
  0x61   :  { %v1901_v38 = vshrl.u32 %v197_v37, 7  ;;  %v1709_v37 = vld [vmem:[#allocation8 + $0x278] ss:$28 sps:$4 sm:$0xff]  }
  0x63   :  { %1096 = vmatpush1.bf16.msra.mxu0 %v1603_v39  ;;  %v203_v39 = vsub.s32 1, %v1901_v38 }
  0x64   :  { %1097 = vmatprep.subr.bf16.mxu0 %v1611_v40  ;;  %v199_v40 = vsub.s32 0, %v1901_v38 }
  0x67   :  { %1098 = vmatpush2.bf16.msra.mxu0 %v1609_v41  ;;  %v195_v41 = vld [vmem:[%s1940_s4] sm:$0x3] }
  0x68   :  { %1099 = vmatprep.subr.bf16.mxu0 %v1617_v42  ;;  %v204_v42 = vrot.slane %v195_v41, %v203_v39 }
  0x6b   :  { %1100 = vmatpush2.bf16.msra.mxu0 %v1615_v43  ;;  %v200_v43 = vrot.slane %v195_v41, %v199_v40  ;;  %v1714_v41 = vld [vmem:[#allocation8 + $0x244] ss:$28 sps:$4 sm:$0xff]  }
  0x6c   :  { %1101 = vmatprep.subr.bf16.mxu0 %v1623_v44 }
  0x6f   :  { %1102 = vmatpush2.bf16.msra.mxu0 %v1621_v45 }
  0x70   :  { %1103 = vmatprep.subr.bf16.mxu0 %v1629_v46 }
  0x73   :  { %1104 = vmatpush2.bf16.msra.mxu0 %v1627_v47 }
  0x74   :  { %1105 = vmatprep.subr.bf16.mxu0 %v1635_v48 }
  0x77   :  { %1106 = vmatpush2.bf16.msra.mxu0 %v1633_v49 }
  0x78   :  { %1107 = vmatprep.subr.bf16.mxu0 %v1641_v23  ;;  %v1691_v23 = vld [vmem:[#allocation8 + $0x50] ss:$28 sps:$4 sm:$0xff]  }
  0x7b   :  { %1108 = vmatpush2.bf16.msra.mxu0 %v1639_v25  ;;  %v1695_v25 = vld [vmem:[#allocation8 + $0x1d8] ss:$28 sps:$4 sm:$0xff]  }
  0x7c   :  { %1109 = vmatprep.subr.bf16.mxu0 %v1647_v27  ;;  %v1696_v27 = vld [vmem:[#allocation8 + $0x18] ss:$28 sps:$4 sm:$0xff]  }
  0x7f   :  { %1110 = vmatpush2.bf16.msra.mxu0 %v1645_v29  ;;  %v1697_v29 = vld [vmem:[#allocation8 + $0x358] ss:$28 sps:$4 sm:$0xff]  }
  0x80   :  { %1111 = vmatprep.subr.bf16.mxu0 %v1653_v31  ;;  %v1700_v31 = vld [vmem:[#allocation8 + $0x320] ss:$28 sps:$4 sm:$0xff]  }
  0x83   :  { %1112 = vmatpush2.bf16.msra.mxu0 %v1651_v33  ;;  %v1703_v33 = vld [vmem:[#allocation8 + $0x2e8] ss:$28 sps:$4 sm:$0xff]  }
  0x84   :  { %1167 = vmatprep.subr.bf16.mxu0 %v1659_v35  ;;  %v1706_v35 = vld [vmem:[#allocation8 + $0x2b0] ss:$28 sps:$4 sm:$0xff]  }
 0x106   :  { %v167_v51 = vpop.f32.mrf.mxu0 }
 0x107   :  { %v168_v52 = vadd.f32 %v1328_v50, %v167_v51 }
 0x108   :  { %v1516_v53 = vpop.f32.mrf.mxu0 }
 0x109   :  { %v174_v55 = vmul.f32 0.01, %v168_v52 }
 0x10a   :  { %v170_v54 = vpop.f32.mrf.mxu0 }
 0x10b   :  { %v171_v56 = vadd.f32 %v1328_v50, %v170_v54  ;;  %v176_v59 = vmax.f32 %v168_v52, %v174_v55 }
 0x10c   :  { %v1517_v57 = vpop.f32.mrf.mxu0 }
 0x10d   :  { %v175_v58 = vmul.f32 0.01, %v171_v56 }
 0x10f   :  { %v177_v60 = vmax.f32 %v171_v56, %v175_v58 }
 0x111   :  { %v178_v62 = vpack.c.bf16 %v177_v60, %v176_v59 }
 0x113   :  { %320 = vmatmul.mubr.bf16.vlgmr.msra.gmra.mxu1 %v178_v62  ;;  %v1661_v62 = vld [vmem:[#allocation8 + $0x1a0] ss:$28 sps:$4 sm:$0xff]  }
 0x114   :  { %1125 = vmatpush1.bf16.msra.mxu1 %v1564_v61  ;;  %v1657_v61 = vld [vmem:[#allocation8 + $0x198] ss:$28 sps:$4 sm:$0xff]  }
 0x115   :  { %1126 = vmatprep.subr.bf16.mxu1 %v1572_v63 }
 0x118   :  { %1127 = vmatpush1.bf16.msra.mxu1 %v1570_v0  ;;  %v1664_v0 = vld [vmem:[#allocation8 + $0x164] ss:$28 sps:$4 sm:$0xff]  }
 0x119   :  { %1128 = vmatprep.subr.bf16.mxu1 %v1578_v1  ;;  %v1665_v1 = vld [vmem:[#allocation8 + $0x328] ss:$28 sps:$4 sm:$0xff]  }
 0x11c   :  { %1129 = vmatpush1.bf16.msra.mxu1 %v1576_v2  ;;  %v1662_v2 = vld [vmem:[#allocation8 + $0x160] ss:$28 sps:$4 sm:$0xff]  }
 0x11d   :  { %1130 = vmatprep.subr.bf16.mxu1 %v1584_v3  ;;  %v1666_v3 = vld [vmem:[#allocation8 + $0x168] ss:$28 sps:$4 sm:$0xff]  }
 0x120   :  { %1131 = vmatpush1.bf16.msra.mxu1 %v1582_v4  ;;  %v1669_v4 = vld [vmem:[#allocation8 + $0x12c] ss:$28 sps:$4 sm:$0xff]  }
 0x121   :  { %1132 = vmatprep.subr.bf16.mxu1 %v1590_v5  ;;  %v1670_v5 = vld [vmem:[#allocation8 + $0x2f0] ss:$28 sps:$4 sm:$0xff]  }
 0x124   :  { %1133 = vmatpush1.bf16.msra.mxu1 %v1588_v6  ;;  %v1667_v6 = vld [vmem:[#allocation8 + $0x128] ss:$28 sps:$4 sm:$0xff]  }
 0x125   :  { %1134 = vmatprep.subr.bf16.mxu1 %v1596_v7  ;;  %v1671_v7 = vld [vmem:[#allocation8 + $0x130] ss:$28 sps:$4 sm:$0xff]  }
 0x128   :  { %1135 = vmatpush1.bf16.msra.mxu1 %v1594_v8  ;;  %v1674_v8 = vld [vmem:[#allocation8 + $0xf4] ss:$28 sps:$4 sm:$0xff]  }
 0x129   :  { %1136 = vmatprep.subr.bf16.mxu1 %v1602_v9  ;;  %v1675_v9 = vld [vmem:[#allocation8 + $0x2b8] ss:$28 sps:$4 sm:$0xff]  }
 0x12c   :  { %1137 = vmatpush1.bf16.msra.mxu1 %v1600_v10  ;;  %v1672_v10 = vld [vmem:[#allocation8 + $0xf0] ss:$28 sps:$4 sm:$0xff]  }
 0x12d   :  { %1138 = vmatprep.subr.bf16.mxu1 %v1608_v11  ;;  %v1676_v11 = vld [vmem:[#allocation8 + $0xf8] ss:$28 sps:$4 sm:$0xff]  }
 0x130   :  { %1139 = vmatpush1.bf16.msra.mxu1 %v1606_v12  ;;  %v1679_v12 = vld [vmem:[#allocation8 + $0xbc] ss:$28 sps:$4 sm:$0xff]  }
 0x131   :  { %1140 = vmatprep.subr.bf16.mxu1 %v1614_v13  ;;  %v1680_v13 = vld [vmem:[#allocation8 + $0x280] ss:$28 sps:$4 sm:$0xff]  }
 0x134   :  { %1141 = vmatpush2.bf16.msra.mxu1 %v1612_v14  ;;  %v1677_v14 = vld [vmem:[#allocation8 + $0xb8] ss:$28 sps:$4 sm:$0xff]  }
 0x135   :  { %1142 = vmatprep.subr.bf16.mxu1 %v1620_v15  ;;  %v1681_v15 = vld [vmem:[#allocation8 + $0xc0] ss:$28 sps:$4 sm:$0xff]  }
 0x138   :  { %1143 = vmatpush2.bf16.msra.mxu1 %v1618_v16  ;;  %v1684_v16 = vld [vmem:[#allocation8 + $0x84] ss:$28 sps:$4 sm:$0xff]  }
 0x139   :  { %1144 = vmatprep.subr.bf16.mxu1 %v1626_v17  ;;  %v1685_v17 = vld [vmem:[#allocation8 + $0x248] ss:$28 sps:$4 sm:$0xff]  }
 0x13c   :  { %1145 = vmatpush2.bf16.msra.mxu1 %v1624_v18  ;;  %v1682_v18 = vld [vmem:[#allocation8 + $0x80] ss:$28 sps:$4 sm:$0xff]  }
 0x13d   :  { %1146 = vmatprep.subr.bf16.mxu1 %v1632_v19  ;;  %v1686_v19 = vld [vmem:[#allocation8 + $0x88] ss:$28 sps:$4 sm:$0xff]  }
 0x140   :  { %1147 = vmatpush2.bf16.msra.mxu1 %v1630_v20  ;;  %v1689_v20 = vld [vmem:[#allocation8 + $0x4c] ss:$28 sps:$4 sm:$0xff]  }
 0x141   :  { %1148 = vmatprep.subr.bf16.mxu1 %v1638_v21  ;;  %v1690_v21 = vld [vmem:[#allocation8 + $0x210] ss:$28 sps:$4 sm:$0xff]  }
 0x144   :  { %1149 = vmatpush2.bf16.msra.mxu1 %v1636_v22  ;;  %v1687_v22 = vld [vmem:[#allocation8 + $0x48] ss:$28 sps:$4 sm:$0xff]  }
 0x145   :  { %1150 = vmatprep.subr.bf16.mxu1 %v1644_v24  ;;  %v1694_v24 = vld [vmem:[#allocation8 + $0x14] ss:$28 sps:$4 sm:$0xff]  }
 0x148   :  { %1151 = vmatpush2.bf16.msra.mxu1 %v1642_v26  ;;  %v1692_v26 = vld [vmem:[#allocation8 + $0x10] ss:$28 sps:$4 sm:$0xff]  }
 0x149   :  { %1152 = vmatprep.subr.bf16.mxu1 %v1650_v28  ;;  %v1699_v28 = vld [vmem:[#allocation8 + $0x35c] ss:$28 sps:$4 sm:$0xff]  }
 0x14c   :  { %1153 = vmatpush2.bf16.msra.mxu1 %v1648_v30  ;;  %v1702_v30 = vld [vmem:[#allocation8 + $0x324] ss:$28 sps:$4 sm:$0xff]  }
 0x14d   :  { %1154 = vmatprep.subr.bf16.mxu1 %v1656_v32  ;;  %v1705_v32 = vld [vmem:[#allocation8 + $0x2ec] ss:$28 sps:$4 sm:$0xff]  }
 0x150   :  { %1155 = vmatpush2.bf16.msra.mxu1 %v1654_v34  ;;  %v1708_v34 = vld [vmem:[#allocation8 + $0x2b4] ss:$28 sps:$4 sm:$0xff]  }
 0x151   :  { %1484 = vmatprep.subr.bf16.mxu1 %v1660_v36  ;;  %v1711_v36 = vld [vmem:[#allocation8 + $0x27c] ss:$28 sps:$4 sm:$0xff]  }
 0x1d3   :  { %v321_v44 = vpop.f32.mrf.mxu1 }
 0x1d4   :  { %v322_v47 = vadd.f32 %v321_v44, %v200_v43  ;;  %v1715_v44 = vld [vmem:[#allocation8 + $0x208] ss:$28 sps:$4 sm:$0xff]  }
 0x1d5   :  { %v323_v45 = vpop.f32.mrf.mxu1 }
 0x1d6   :  { %v324_v46 = vadd.f32 %v323_v45, %v204_v42  ;;  %v330_v54 = vmul.f32 0.01, %v322_v47  ;;  %v1720_v45 = vld [vmem:[#allocation8 + $0x1d4] ss:$28 sps:$4 sm:$0xff]  }
 0x1d7   :  { %v325_v48 = vpop.f32.mrf.mxu1 }
 0x1d8   :  { %v326_v49 = vadd.f32 %v325_v48, %v200_v43  ;;  %v331_v51 = vmul.f32 0.01, %v324_v46  ;;  %v334_v59 = vmax.f32 %v322_v47, %v330_v54  ;;  %v1717_v43 = vld [vmem:[#allocation8 + $0x20c] ss:$28 sps:$4 sm:$0xff]   ;;  %v480_v47 = vsub.s32 2, %v1901_v38  ;;  %v468_v48 = vld [vmem:[%s1942_s6] sm:$0xff] }
 0x1d9   :  { %v327_v50 = vpop.f32.mrf.mxu1  ;;  %s1842_s6 = smov [#allocation10]  }
 0x1da   :  { %v332_v52 = vmul.f32 0.01, %v326_v49  ;;  %v328_v53 = vadd.f32 %v327_v50, %v204_v42  ;;  %v335_v57 = vmax.f32 %v324_v46, %v331_v51  ;;  %v1712_v42 = vld [vmem:[#allocation8 + $0x240] ss:$28 sps:$4 sm:$0xff]   ;;  %v1718_v46 = vld [vmem:[#allocation8 + $0x1d0] ss:$28 sps:$4 sm:$0xff]   ;;  %v481_v50 = vrot.slane %v468_v48, %v480_v47 }
 0x1db   :  { %v477_v51 = vrot.slane %v468_v48, %v203_v39  ;;  %s1314_s27 = sshll.u32 %s1842_s6, 4  ;;  %s1315_s27 = int_to_ptr.vmem [resolvable:$true] %s1314_s27 }
 0x1dc   :  { %v333_v55 = vmul.f32 0.01, %v328_v53  ;;  %v336_v56 = vmax.f32 %v326_v49, %v332_v52  ;;  %v473_v49 = vrot.slane %v468_v48, %v199_v40  ;;  %s1801_s28 = scalar_lea.vmem %s1315_s27, 896  ;;  %p1806_p7 = scmp.lt.s32.totalorder %s1315_s27, %s1315_s27 }
 0x1dd   :  { %p1802_p6 = scmp.ne.s32.totalorder %s1315_s27, %s1801_s28  ;;  %p1807_p8 = scmp.lt.s32.totalorder %s1801_s28, %s1801_s28 }
 0x1de   :  { %v337_v58 = vmax.f32 %v328_v53, %v333_v55  ;;  %v1912_v63 = vpack.c.bf16 %v336_v56, %v334_v59 }
 0x1df   :  { %p1808_p9 = por %p1807_p8, %p1806_p7 }
 0x1e0   :  { %v339_v60 = vpack.c.bf16 %v337_v58, %v335_v57 }
 0x1e1   :  { %p1809_p10 = pnand %p1808_p9, %p1802_p6 }
 0x1e2   :  { %1113 = vmatprep.mubr.bf16.mxu0 %v339_v60  ;;  %1156 = vmatprep.mubr.bf16.mxu1 %v339_v60 }
 0x1e3   :  { %1114 = vmatmul.mubr.bf16.vlgmr.msra.gmra.mxu0 %v1912_v63  ;;  %1157 = vmatmul.mubr.bf16.vlgmr.msra.gmra.mxu1 %v1912_v63 }
 0x1e4   :  { %1168 = vmatpush1.bf16.msra.mxu0 %v1657_v61  ;;  %1485 = vmatpush3.bf16.msra.mxu1 %v1661_v62 }
 0x1e5   :  { %1199 = vmatprep.mubr.bf16.mxu0 %v339_v60  ;;  %1242 = vmatprep.mubr.bf16.mxu1 %v339_v60 }
 0x1e6   :  { %1169 = vmatprep.subr.bf16.mxu0 %v1664_v0  ;;  %1486 = vmatprep.subr.bf16.mxu1 %v1665_v1 }
 0x1e8   :  { %1170 = vmatpush1.bf16.msra.mxu0 %v1662_v2  ;;  %1487 = vmatpush3.bf16.msra.mxu1 %v1666_v3 }
 0x1e9   :  { %1171 = vmatprep.subr.bf16.mxu0 %v1669_v4  ;;  %1488 = vmatprep.subr.bf16.mxu1 %v1670_v5 }
 0x1ec   :  { %1172 = vmatpush1.bf16.msra.mxu0 %v1667_v6  ;;  %1489 = vmatpush3.bf16.msra.mxu1 %v1671_v7 }
 0x1ed   :  { %1173 = vmatprep.subr.bf16.mxu0 %v1674_v8  ;;  %1490 = vmatprep.subr.bf16.mxu1 %v1675_v9 }
 0x1f0   :  { %1174 = vmatpush1.bf16.msra.mxu0 %v1672_v10  ;;  %1491 = vmatpush3.bf16.msra.mxu1 %v1676_v11 }
 0x1f1   :  { %1175 = vmatprep.subr.bf16.mxu0 %v1679_v12  ;;  %1492 = vmatprep.subr.bf16.mxu1 %v1680_v13  ;;  %v484_v12 = vsub.s32 3, %v1901_v38  ;;  %v488_v13 = vsub.s32 4, %v1901_v38 }
 0x1f4   :  { %1176 = vmatpush1.bf16.msra.mxu0 %v1677_v14  ;;  %1493 = vmatpush3.bf16.msra.mxu1 %v1681_v15  ;;  %v496_v14 = vsub.s32 6, %v1901_v38  ;;  %v492_v15 = vsub.s32 5, %v1901_v38 }
 0x1f5   :  { %1177 = vmatprep.subr.bf16.mxu0 %v1684_v16  ;;  %1494 = vmatprep.subr.bf16.mxu1 %v1685_v17  ;;  %v485_v17 = vrot.slane %v468_v48, %v484_v12 }
 0x1f8   :  { %1178 = vmatpush1.bf16.msra.mxu0 %v1682_v18  ;;  %1495 = vmatpush3.bf16.msra.mxu1 %v1686_v19  ;;  %v489_v18 = vrot.slane %v468_v48, %v488_v13  ;;  %v497_v19 = vrot.slane %v468_v48, %v496_v14 }
 0x1f9   :  { %1179 = vmatprep.subr.bf16.mxu0 %v1689_v20  ;;  %1496 = vmatprep.subr.bf16.mxu1 %v1690_v21  ;;  %v493_v21 = vrot.slane %v468_v48, %v492_v15 }
 0x1fc   :  { %1180 = vmatpush1.bf16.msra.mxu0 %v1687_v22  ;;  %1497 = vmatpush3.bf16.msra.mxu1 %v1691_v23 }
 0x1fd   :  { %1181 = vmatprep.subr.bf16.mxu0 %v1694_v24  ;;  %1498 = vmatprep.subr.bf16.mxu1 %v1695_v25 }
 0x200   :  { %1182 = vmatpush1.bf16.msra.mxu0 %v1692_v26  ;;  %1499 = vmatpush3.bf16.msra.mxu1 %v1696_v27 }
 0x201   :  { %1183 = vmatprep.subr.bf16.mxu0 %v1699_v28 }
 0x203   :  { %1243 = vmatmul.mubr.bf16.vlgmr.msra.gmra.mxu1 %v1912_v63 }
 0x204   :  { %1184 = vmatpush2.bf16.msra.mxu0 %v1697_v29 }
 0x205   :  { %1185 = vmatprep.subr.bf16.mxu0 %v1702_v30 }
 0x208   :  { %1186 = vmatpush2.bf16.msra.mxu0 %v1700_v31 }
 0x209   :  { %1187 = vmatprep.subr.bf16.mxu0 %v1705_v32 }
 0x20c   :  { %1188 = vmatpush2.bf16.msra.mxu0 %v1703_v33 }
 0x20d   :  { %1189 = vmatprep.subr.bf16.mxu0 %v1708_v34 }
 0x210   :  { %1190 = vmatpush2.bf16.msra.mxu0 %v1706_v35 }
 0x211   :  { %1191 = vmatprep.subr.bf16.mxu0 %v1711_v36 }
 0x214   :  { %1192 = vmatpush2.bf16.msra.mxu0 %v1709_v37 }
 0x215   :  { %1193 = vmatprep.subr.bf16.mxu0 %v1714_v41 }
 0x218   :  { %1194 = vmatpush2.bf16.msra.mxu0 %v1712_v42 }
 0x219   :  { %1195 = vmatprep.subr.bf16.mxu0 %v1717_v43 }
 0x21c   :  { %1196 = vmatpush2.bf16.msra.mxu0 %v1715_v44 }
 0x21d   :  { %1197 = vmatprep.subr.bf16.mxu0 %v1720_v45 }
 0x220   :  { %1198 = vmatpush2.bf16.msra.mxu0 %v1718_v46 }
 0x223   :  { %1200 = vmatmul.mubr.bf16.vlgmr.msra.gmra.mxu0 %v1912_v63 }
 0x2a3   :  { %v1115_v52 = vpop.f32.mrf.mxu0  ;;  %v1158_v53 = vpop.f32.mrf.mxu1 }
 0x2a4   :  { %v1116_v54 = vadd.f32 %v1115_v52, %v473_v49  ;;  %v1159_v55 = vadd.f32 %v1158_v53, %v481_v50 }
 0x2a5   :  { %v1117_v56 = vpop.f32.mrf.mxu0  ;;  %v1160_v57 = vpop.f32.mrf.mxu1 }
 0x2a6   :  { %v1253_v58 = vand.u32 2147483647, %v1159_v55  ;;  %v1118_v59 = vadd.f32 %v1117_v56, %v477_v51  ;;  %v1251_v60 = vand.u32 2147483647, %v1116_v54  ;;  %v1161_v24 = vadd.f32 %v1160_v57, %v485_v17 }
 0x2a7   :  { %v1119_v61 = vpop.f32.mrf.mxu0  ;;  %v1162_v62 = vpop.f32.mrf.mxu1 }
 0x2a8   :  { %v1472_v63 = vpack.c.bf16 %v1253_v58, %v1253_v58  ;;  %v1252_v0 = vand.u32 2147483647, %v1118_v59  ;;  %v1120_v1 = vadd.f32 %v1119_v61, %v473_v49  ;;  %v1163_v2 = vadd.f32 %v1162_v62, %v481_v50 }
 0x2a9   :  { %v1121_v40 = vpop.f32.mrf.mxu0  ;;  %v1164_v9 = vpop.f32.mrf.mxu1 }
 0x2aa   :  { %1278 = vst [vmem:[#allocation10 + $0x8] sm:$0xf] %v1472_v63  ;;  %v1471_v3 = vpack.c.bf16 %v1252_v0, %v1251_v60  ;;  %v1256_v4 = vand.u32 2147483647, %v1163_v2  ;;  %v1122_v39 = vadd.f32 %v1121_v40, %v477_v51  ;;  %v1254_v5 = vand.u32 2147483647, %v1120_v1 }
 0x2ab   :  { %v1165_v32 = vadd.f32 %v1164_v9, %v485_v17 }
 0x2ac   :  { %1277 = vst [vmem:[#allocation10] sm:$0xff] %v1471_v3  ;;  %v1474_v6 = vpack.c.bf16 %v1256_v4, %v1256_v4  ;;  %v1255_v7 = vand.u32 2147483647, %v1122_v39 }
 0x2ae   :  { %1280 = vst [vmem:[#allocation10 + $0x24] sm:$0xf] %v1474_v6  ;;  %v1473_v8 = vpack.c.bf16 %v1255_v7, %v1254_v5 }
 0x2b0   :  { %1279 = vst [vmem:[#allocation10 + $0x1c] sm:$0xff] %v1473_v8 }
 0x2c3   :  { %v1500_v10 = vpop.f32.mrf.mxu1 }
 0x2c5   :  { %v1501_v11 = vpop.f32.mrf.mxu1 }
 0x2c6   :  { %v1502_v20 = vadd.f32 %v1501_v11, %v1500_v10 }
 0x2c7   :  { %v1503_v16 = vpop.f32.mrf.mxu1 }
 0x2c8   :  { %v1245_v27 = vadd.f32 %v1502_v20, %v497_v19 }
 0x2c9   :  { %v1504_v22 = vpop.f32.mrf.mxu1 }
 0x2ca   :  { %v1505_v28 = vadd.f32 %v1504_v22, %v1503_v16 }
 0x2cc   :  { %v1248_v35 = vadd.f32 %v1505_v28, %v497_v19 }
 0x2e3   :  { %v1201_v23 = vpop.f32.mrf.mxu0 }
 0x2e4   :  { %v1202_v25 = vadd.f32 %v1201_v23, %v489_v18 }
 0x2e5   :  { %v1203_v26 = vpop.f32.mrf.mxu0 }
 0x2e6   :  { %v1475_v29 = vpack.c.bf16 %v1202_v25, %v1161_v24  ;;  %v1204_v30 = vadd.f32 %v1203_v26, %v493_v21 }
 0x2e7   :  { %v1205_v31 = vpop.f32.mrf.mxu0 }
 0x2e8   :  { %1305 = vst [vmem:[#allocation10 + $0xc] sm:$0xff] %v1475_v29  ;;  %v1476_v33 = vpack.c.bf16 %v1245_v27, %v1204_v30  ;;  %v1206_v38 = vadd.f32 %v1205_v31, %v489_v18 }
 0x2e9   :  { %v1207_v34 = vpop.f32.mrf.mxu0 }
 0x2ea   :  { %1306 = vst [vmem:[#allocation10 + $0x14] sm:$0xff] %v1476_v33  ;;  %v1477_v36 = vpack.c.bf16 %v1206_v38, %v1165_v32  ;;  %v1208_v37 = vadd.f32 %v1207_v34, %v493_v21 }
 0x2ec   :  { %1307 = vst [vmem:[#allocation10 + $0x28] sm:$0xff] %v1477_v36  ;;  %v1478_v41 = vpack.c.bf16 %v1248_v35, %v1208_v37 }
 0x2ee   :  { %1308 = vst [vmem:[#allocation10 + $0x30] sm:$0xff] %v1478_v41 }
 0x2ef   :  { %1812 = shalt.err (!%p1809_p10)
}
 0x2f0   :  { %1320 = dma.vmem_to_hbm [thread:$0]  %s1315_s27, 896, %s1943_s7, [#allocation4], %s1837_s21, %s1837_s21, %s1838_s22  }
 0x2f1   :  { %1827 = dma.done.wait [#allocation4], 896  }
 0x2f2   :  { %1828 = vsyncadd [#allocation4], 4294966400 }
 0x2f3   :  { %1324 = vsyncpa [#allocation3], 1 }
 0x2f4   :  { %1325 = vsyncpa [#allocation6], 1 }
 0x2f5   :  { %1326 = vsyncpa [#allocation9], 1 }
 0x2f6   :  { %1327 = vsyncpa [#allocation4], 1 }

</bundles_post_ra>
